<compile_context>
chip_gen: v7x
topology: tpu7x:2x2x1
jax: 0.10.0
libtpu: 0.0.40
codegen_flags: <defaults>
</compile_context>

<pallas_src>
from functools import partial

import jax
import jax.numpy as jnp
from jax.experimental import pallas as pl
from jax.experimental.pallas import tpu as pltpu


def _aspp_kernel(x18_ref, x12_ref, x6_ref, x1_ref, w_ref, b_ref, o_ref,
                 xcol_ref, *, H, W):
    """One image per grid step.

    x*_ref  : (1, Cin, H*W)   branch inputs (channels on sublanes, spatial on lanes)
    w_ref   : (Co, 28*Cin)    fused weights, columns = [18-taps | 12-taps | 6-taps | 1x1]
    b_ref   : (Co, 1)         fused bias (final conv folded in), f32
    o_ref   : (1, Co, H*W)
    xcol_ref: (28*Cin, H*W)   VMEM im2col scratch (input dtype)
    """
    HW = H * W
    Cin = x18_ref.shape[1]

    # Flat spatial / column index of every lane position, computed once in-kernel
    # (replaces the old widx_ref input).
    pos = jax.lax.broadcasted_iota(jnp.int32, (1, HW), 1)
    col = jax.lax.rem(pos, W)

    piece = 0
    for x_ref, d in ((x18_ref, 18), (x12_ref, 12), (x6_ref, 6)):
        x = x_ref[0]                                       # (Cin, HW), loaded once
        for ih in range(3):
            dh = (ih - 1) * d
            h_lo, h_hi = max(0, -dh), min(H, H - dh)       # valid output rows
            for iw in range(3):
                dw = (iw - 1) * d
                w_lo, w_hi = max(0, -dw), min(W, W - dw)   # valid output cols
                r0 = piece * Cin                           # static, Cin-aligned
                piece += 1
                if h_lo >= h_hi or w_lo >= w_hi:
                    # Tap lies entirely in the zero padding (dilation >= H or W).
                    xcol_ref[r0:r0 + Cin, :] = jnp.zeros_like(x)
                    continue
                off = dh * W + dw                          # flat source offset
                # want xs[:, p] = x[:, p + off]; roll (jnp.roll semantics) by -off.
                xs = pltpu.roll(x, shift=(-off) % HW, axis=1) if off != 0 else x
                # Zero positions whose source tap falls in the padding (this also
                # kills the circular wrap-around introduced by the roll).
                conds = []
                if h_lo > 0:
                    conds.append(pos >= h_lo * W)
                if h_hi < H:
                    conds.append(pos < h_hi * W)
                if w_lo > 0:
                    conds.append(col >= w_lo)
                if w_hi < W:
                    conds.append(col < w_hi)
                if conds:
                    m = conds[0]
                    for c in conds[1:]:
                        m = m & c
                    xs = jnp.where(m, xs, jnp.zeros_like(xs))
                xcol_ref[r0:r0 + Cin, :] = xs
    # 1x1 branch (atrous_block1 on features[3]): no shift, no mask.
    xcol_ref[piece * Cin:(piece + 1) * Cin, :] = x1_ref[0]

    # Entire ASPP module = one deep matmul per image (K = 28*Cin), f32 accumulation.
    acc = jnp.dot(w_ref[...], xcol_ref[...], preferred_element_type=jnp.float32)
    o_ref[0] = (acc + b_ref[...]).astype(o_ref.dtype)


def aspp_pallas(features, params):
    """features: 4 arrays of shape (B, Cin, H, W) (NCHW).  Returns (B, Co, H, W)."""
    f0, f1, f2, f3 = features
    B, Cin, H, W = f0.shape
    Co = params["w1"].shape[0]
    HW = H * W
    dtype = f0.dtype
    hi = jax.lax.Precision.HIGHEST

    # NCHW -> (B, Cin, H*W): pure reshape (no transpose); spatial axis is lane-dense.
    xs = [f.reshape(B, Cin, HW) for f in (f0, f1, f2, f3)]

    # Fold the final 1x1 conv into every branch weight and into one fused bias.
    wf = params["wf"][:, :, 0, 0]                           # (Co, 4*Co)

    def fuse3(w3, br):                                      # w3: (Co, Cin, 3, 3)
        wf_b = wf[:, br * Co:(br + 1) * Co]                 # (Co, Co)
        t = jnp.einsum("oc,cikl->okli", wf_b, w3, precision=hi)   # (Co, 3, 3, Cin)
        return t.reshape(Co, 9 * Cin)                       # tap-major, Cin-minor

    w_fused = jnp.concatenate(
        [fuse3(params["w18"], 0), fuse3(params["w12"], 1), fuse3(params["w6"], 2),
         jnp.einsum("oc,ci->oi", wf[:, 3 * Co:], params["w1"][:, :, 0, 0],
                    precision=hi)],
        axis=1).astype(dtype)                               # (Co, 28*Cin)

    b_fused = (params["bf"]
               + wf[:, 0:Co] @ params["b18"]
               + wf[:, Co:2 * Co] @ params["b12"]
               + wf[:, 2 * Co:3 * Co] @ params["b6"]
               + wf[:, 3 * Co:] @ params["b1"]).reshape(Co, 1).astype(jnp.float32)

    K = 28 * Cin

    out = pl.pallas_call(
        partial(_aspp_kernel, H=H, W=W),
        out_shape=jax.ShapeDtypeStruct((B, Co, HW), dtype),
        grid=(B,),
        in_specs=[pl.BlockSpec((1, Cin, HW), lambda b: (b, 0, 0))] * 4 + [
            pl.BlockSpec((Co, K), lambda b: (0, 0)),        # weights stay VMEM-resident
            pl.BlockSpec((Co, 1), lambda b: (0, 0)),
        ],
        out_specs=pl.BlockSpec((1, Co, HW), lambda b: (b, 0, 0)),
        scratch_shapes=[pltpu.VMEM((K, HW), dtype)],
        compiler_params=pltpu.CompilerParams(
            dimension_semantics=("parallel",)),
    )(xs[0], xs[1], xs[2], xs[3], w_fused, b_fused)

    return out.reshape(B, Co, H, W)


def _aspp_reference(features, params):
    """Pure-JAX reference mirroring the PyTorch module exactly."""
    f0, f1, f2, f3 = features

    def conv(x, w, b, dilation, padding):
        y = jax.lax.conv_general_dilated(
            x, w, window_strides=(1, 1),
            padding=((padding, padding), (padding, padding)),
            rhs_dilation=(dilation, dilation),
            dimension_numbers=("NCHW", "OIHW", "NCHW"),
            precision=jax.lax.Precision.HIGHEST)
        return y + b.reshape(1, -1, 1, 1)

    y18 = conv(f0, params["w18"], params["b18"], 18, 18)
    y12 = conv(f1, params["w12"], params["b12"], 12, 12)
    y6 = conv(f2, params["w6"], params["b6"], 6, 6)
    y1 = conv(f3, params["w1"], params["b1"], 1, 0)
    cat = jnp.concatenate([y18, y12, y6, y1], axis=1)
    return conv(cat, params["wf"], params["bf"], 1, 0)


if __name__ == "__main__":
    key = jax.random.PRNGKey(0)
    # H=W=32: H*W = 1024 keeps the lane axis a multiple of 128, and all three
    # dilations (6/12/18) still hit the zero-padding boundary handling.
    B, Cin, Co, H, W = 2, 8, 8, 32, 32
    keys = jax.random.split(key, 14)

    def uniform(k, shape, scale):
        return jax.random.uniform(k, shape, jnp.float32, -scale, scale)

    features = tuple(
        jax.random.uniform(keys[i], (B, Cin, H, W), dtype=jnp.float32)
        for i in range(4))

    s3 = (Cin * 9) ** -0.5
    s1 = float(Cin) ** -0.5
    sf = (4 * Co) ** -0.5
    params = {
        "w18": uniform(keys[4], (Co, Cin, 3, 3), s3), "b18": uniform(keys[5], (Co,), s3),
        "w12": uniform(keys[6], (Co, Cin, 3, 3), s3), "b12": uniform(keys[7], (Co,), s3),
        "w6":  uniform(keys[8], (Co, Cin, 3, 3), s3), "b6":  uniform(keys[9], (Co,), s3),
        "w1":  uniform(keys[10], (Co, Cin, 1, 1), s1), "b1": uniform(keys[11], (Co,), s1),
        "wf":  uniform(keys[12], (Co, 4 * Co, 1, 1), sf), "bf": uniform(keys[13], (Co,), sf),
    }

    out = aspp_pallas(features, params)
    out = jax.block_until_ready(out)

    ref = _aspp_reference(features, params)
    assert out.shape == (B, Co, H, W)
    max_err = float(jnp.max(jnp.abs(out - ref)))
    # Folding the final 1x1 into the branch weights reassociates the f32 sums, so the
    # result is not bitwise identical to the reference; 5e-3 leaves ample headroom.
    assert max_err < 5e-3, max_err
    print("KERNEL_OK")
</pallas_src>

<mosaic_0001>
module attributes {stable_mosaic.version = 11 : i64} {
  func.func @_aspp_kernel(%arg0: i32, %arg1: memref<1x8x1024xf32, #tpu.memory_space<vmem>>, %arg2: memref<1x8x1024xf32, #tpu.memory_space<vmem>>, %arg3: memref<1x8x1024xf32, #tpu.memory_space<vmem>>, %arg4: memref<1x8x1024xf32, #tpu.memory_space<vmem>>, %arg5: memref<8x224xf32, #tpu.memory_space<vmem>>, %arg6: memref<8x1xf32, #tpu.memory_space<vmem>>, %arg7: memref<1x8x1024xf32, #tpu.memory_space<vmem>>, %arg8: memref<224x1024xf32, #tpu.memory_space<vmem>>) attributes {dimension_semantics = [#tpu.dimension_semantics<parallel>], iteration_bounds = array<i64: 2>, scalar_prefetch = 0 : i64, scratch_operands = 1 : i64, tpu.core_type = #tpu.core_type<tc>, window_params = [{transform_indices = @transform_0, window_bounds = array<i64: 1, 8, 1024>}, {transform_indices = @transform_1, window_bounds = array<i64: 1, 8, 1024>}, {transform_indices = @transform_2, window_bounds = array<i64: 1, 8, 1024>}, {transform_indices = @transform_3, window_bounds = array<i64: 1, 8, 1024>}, {pipeline_mode = #tpu.pipeline_mode<synchronous>, transform_indices = @transform_4, window_bounds = array<i64: 8, 224>}, {pipeline_mode = #tpu.pipeline_mode<synchronous>, transform_indices = @transform_5, window_bounds = array<i64: 8, 1>}, {transform_indices = @transform_6, window_bounds = array<i64: 1, 8, 1024>}]} {
    %0 = tpu.iota {dimensions = array<i32: 1>} : vector<1x1024xi32>
    %c32_i32 = arith.constant 32 : i32
    %1 = vector.broadcast %c32_i32 : i32 to vector<1x1024xi32>
    %2 = arith.remsi %0, %1 : vector<1x1024xi32>
    %c0 = arith.constant 0 : index
    %c0_0 = arith.constant 0 : index
    %c0_1 = arith.constant 0 : index
    %3 = vector.load %arg1[%c0, %c0_0, %c0_1] : memref<1x8x1024xf32, #tpu.memory_space<vmem>>, vector<1x8x1024xf32>
    %4 = vector.shape_cast %3 : vector<1x8x1024xf32> to vector<8x1024xf32>
    %c594_i32 = arith.constant 594 : i32
    %5 = tpu.dynamic_rotate %4 by %c594_i32 dim 1 : vector<8x1024xf32>, i32 -> vector<8x1024xf32>
    %c576_i32 = arith.constant 576 : i32
    %6 = vector.broadcast %c576_i32 : i32 to vector<1x1024xi32>
    %7 = arith.cmpi sge, %0, %6 : vector<1x1024xi32>
    %c18_i32 = arith.constant 18 : i32
    %8 = vector.broadcast %c18_i32 : i32 to vector<1x1024xi32>
    %9 = arith.cmpi sge, %2, %8 : vector<1x1024xi32>
    %10 = arith.andi %7, %9 : vector<1x1024xi1>
    %cst = arith.constant 0.000000e+00 : f32
    %11 = vector.broadcast %cst : f32 to vector<8x1024xf32>
    %12 = vector.shape_cast %10 : vector<1x1024xi1> to vector<1x1024xi1>
    %13 = vector.broadcast %12 : vector<1x1024xi1> to vector<8x1024xi1>
    %14 = arith.select %13, %5, %11 : vector<8x1024xi1>, vector<8x1024xf32>
    %c0_2 = arith.constant 0 : index
    %c0_3 = arith.constant 0 : index
    %15 = vector.load %arg8[%c0_2, %c0_3] : memref<224x1024xf32, #tpu.memory_space<vmem>>, vector<8x1024xf32>
    tpu.vector_store %arg8[%c0_2, %c0_3], %14 {strides = array<i32>} : memref<224x1024xf32, #tpu.memory_space<vmem>>, vector<8x1024xf32>,
    %c576_i32_4 = arith.constant 576 : i32
    %16 = tpu.dynamic_rotate %4 by %c576_i32_4 dim 1 : vector<8x1024xf32>, i32 -> vector<8x1024xf32>
    %c576_i32_5 = arith.constant 576 : i32
    %17 = vector.broadcast %c576_i32_5 : i32 to vector<1x1024xi32>
    %18 = arith.cmpi sge, %0, %17 : vector<1x1024xi32>
    %cst_6 = arith.constant 0.000000e+00 : f32
    %19 = vector.broadcast %cst_6 : f32 to vector<8x1024xf32>
    %20 = vector.shape_cast %18 : vector<1x1024xi1> to vector<1x1024xi1>
    %21 = vector.broadcast %20 : vector<1x1024xi1> to vector<8x1024xi1>
    %22 = arith.select %21, %16, %19 : vector<8x1024xi1>, vector<8x1024xf32>
    %c8 = arith.constant 8 : index
    %c0_7 = arith.constant 0 : index
    %23 = vector.load %arg8[%c8, %c0_7] : memref<224x1024xf32, #tpu.memory_space<vmem>>, vector<8x1024xf32>
    tpu.vector_store %arg8[%c8, %c0_7], %22 {strides = array<i32>} : memref<224x1024xf32, #tpu.memory_space<vmem>>, vector<8x1024xf32>,
    %c558_i32 = arith.constant 558 : i32
    %24 = tpu.dynamic_rotate %4 by %c558_i32 dim 1 : vector<8x1024xf32>, i32 -> vector<8x1024xf32>
    %c576_i32_8 = arith.constant 576 : i32
    %25 = vector.broadcast %c576_i32_8 : i32 to vector<1x1024xi32>
    %26 = arith.cmpi sge, %0, %25 : vector<1x1024xi32>
    %c14_i32 = arith.constant 14 : i32
    %27 = vector.broadcast %c14_i32 : i32 to vector<1x1024xi32>
    %28 = arith.cmpi slt, %2, %27 : vector<1x1024xi32>
    %29 = arith.andi %26, %28 : vector<1x1024xi1>
    %cst_9 = arith.constant 0.000000e+00 : f32
    %30 = vector.broadcast %cst_9 : f32 to vector<8x1024xf32>
    %31 = vector.shape_cast %29 : vector<1x1024xi1> to vector<1x1024xi1>
    %32 = vector.broadcast %31 : vector<1x1024xi1> to vector<8x1024xi1>
    %33 = arith.select %32, %24, %30 : vector<8x1024xi1>, vector<8x1024xf32>
    %c16 = arith.constant 16 : index
    %c0_10 = arith.constant 0 : index
    %34 = vector.load %arg8[%c16, %c0_10] : memref<224x1024xf32, #tpu.memory_space<vmem>>, vector<8x1024xf32>
    tpu.vector_store %arg8[%c16, %c0_10], %33 {strides = array<i32>} : memref<224x1024xf32, #tpu.memory_space<vmem>>, vector<8x1024xf32>,
    %c18_i32_11 = arith.constant 18 : i32
    %35 = tpu.dynamic_rotate %4 by %c18_i32_11 dim 1 : vector<8x1024xf32>, i32 -> vector<8x1024xf32>
    %c18_i32_12 = arith.constant 18 : i32
    %36 = vector.broadcast %c18_i32_12 : i32 to vector<1x1024xi32>
    %37 = arith.cmpi sge, %2, %36 : vector<1x1024xi32>
    %cst_13 = arith.constant 0.000000e+00 : f32
    %38 = vector.broadcast %cst_13 : f32 to vector<8x1024xf32>
    %39 = vector.shape_cast %37 : vector<1x1024xi1> to vector<1x1024xi1>
    %40 = vector.broadcast %39 : vector<1x1024xi1> to vector<8x1024xi1>
    %41 = arith.select %40, %35, %38 : vector<8x1024xi1>, vector<8x1024xf32>
    %c24 = arith.constant 24 : index
    %c0_14 = arith.constant 0 : index
    %42 = vector.load %arg8[%c24, %c0_14] : memref<224x1024xf32, #tpu.memory_space<vmem>>, vector<8x1024xf32>
    tpu.vector_store %arg8[%c24, %c0_14], %41 {strides = array<i32>} : memref<224x1024xf32, #tpu.memory_space<vmem>>, vector<8x1024xf32>,
    %c32 = arith.constant 32 : index
    %c0_15 = arith.constant 0 : index
    %43 = vector.load %arg8[%c32, %c0_15] : memref<224x1024xf32, #tpu.memory_space<vmem>>, vector<8x1024xf32>
    tpu.vector_store %arg8[%c32, %c0_15], %4 {strides = array<i32>} : memref<224x1024xf32, #tpu.memory_space<vmem>>, vector<8x1024xf32>,
    %c1006_i32 = arith.constant 1006 : i32
    %44 = tpu.dynamic_rotate %4 by %c1006_i32 dim 1 : vector<8x1024xf32>, i32 -> vector<8x1024xf32>
    %c14_i32_16 = arith.constant 14 : i32
    %45 = vector.broadcast %c14_i32_16 : i32 to vector<1x1024xi32>
    %46 = arith.cmpi slt, %2, %45 : vector<1x1024xi32>
    %cst_17 = arith.constant 0.000000e+00 : f32
    %47 = vector.broadcast %cst_17 : f32 to vector<8x1024xf32>
    %48 = vector.shape_cast %46 : vector<1x1024xi1> to vector<1x1024xi1>
    %49 = vector.broadcast %48 : vector<1x1024xi1> to vector<8x1024xi1>
    %50 = arith.select %49, %44, %47 : vector<8x1024xi1>, vector<8x1024xf32>
    %c40 = arith.constant 40 : index
    %c0_18 = arith.constant 0 : index
    %51 = vector.load %arg8[%c40, %c0_18] : memref<224x1024xf32, #tpu.memory_space<vmem>>, vector<8x1024xf32>
    tpu.vector_store %arg8[%c40, %c0_18], %50 {strides = array<i32>} : memref<224x1024xf32, #tpu.memory_space<vmem>>, vector<8x1024xf32>,
    %c466_i32 = arith.constant 466 : i32
    %52 = tpu.dynamic_rotate %4 by %c466_i32 dim 1 : vector<8x1024xf32>, i32 -> vector<8x1024xf32>
    %c448_i32 = arith.constant 448 : i32
    %53 = vector.broadcast %c448_i32 : i32 to vector<1x1024xi32>
    %54 = arith.cmpi slt, %0, %53 : vector<1x1024xi32>
    %c18_i32_19 = arith.constant 18 : i32
    %55 = vector.broadcast %c18_i32_19 : i32 to vector<1x1024xi32>
    %56 = arith.cmpi sge, %2, %55 : vector<1x1024xi32>
    %57 = arith.andi %54, %56 : vector<1x1024xi1>
    %cst_20 = arith.constant 0.000000e+00 : f32
    %58 = vector.broadcast %cst_20 : f32 to vector<8x1024xf32>
    %59 = vector.shape_cast %57 : vector<1x1024xi1> to vector<1x1024xi1>
    %60 = vector.broadcast %59 : vector<1x1024xi1> to vector<8x1024xi1>
    %61 = arith.select %60, %52, %58 : vector<8x1024xi1>, vector<8x1024xf32>
    %c48 = arith.constant 48 : index
    %c0_21 = arith.constant 0 : index
    %62 = vector.load %arg8[%c48, %c0_21] : memref<224x1024xf32, #tpu.memory_space<vmem>>, vector<8x1024xf32>
    tpu.vector_store %arg8[%c48, %c0_21], %61 {strides = array<i32>} : memref<224x1024xf32, #tpu.memory_space<vmem>>, vector<8x1024xf32>,
    %c448_i32_22 = arith.constant 448 : i32
    %63 = tpu.dynamic_rotate %4 by %c448_i32_22 dim 1 : vector<8x1024xf32>, i32 -> vector<8x1024xf32>
    %c448_i32_23 = arith.constant 448 : i32
    %64 = vector.broadcast %c448_i32_23 : i32 to vector<1x1024xi32>
    %65 = arith.cmpi slt, %0, %64 : vector<1x1024xi32>
    %cst_24 = arith.constant 0.000000e+00 : f32
    %66 = vector.broadcast %cst_24 : f32 to vector<8x1024xf32>
    %67 = vector.shape_cast %65 : vector<1x1024xi1> to vector<1x1024xi1>
    %68 = vector.broadcast %67 : vector<1x1024xi1> to vector<8x1024xi1>
    %69 = arith.select %68, %63, %66 : vector<8x1024xi1>, vector<8x1024xf32>
    %c56 = arith.constant 56 : index
    %c0_25 = arith.constant 0 : index
    %70 = vector.load %arg8[%c56, %c0_25] : memref<224x1024xf32, #tpu.memory_space<vmem>>, vector<8x1024xf32>
    tpu.vector_store %arg8[%c56, %c0_25], %69 {strides = array<i32>} : memref<224x1024xf32, #tpu.memory_space<vmem>>, vector<8x1024xf32>,
    %c430_i32 = arith.constant 430 : i32
    %71 = tpu.dynamic_rotate %4 by %c430_i32 dim 1 : vector<8x1024xf32>, i32 -> vector<8x1024xf32>
    %c448_i32_26 = arith.constant 448 : i32
    %72 = vector.broadcast %c448_i32_26 : i32 to vector<1x1024xi32>
    %73 = arith.cmpi slt, %0, %72 : vector<1x1024xi32>
    %c14_i32_27 = arith.constant 14 : i32
    %74 = vector.broadcast %c14_i32_27 : i32 to vector<1x1024xi32>
    %75 = arith.cmpi slt, %2, %74 : vector<1x1024xi32>
    %76 = arith.andi %73, %75 : vector<1x1024xi1>
    %cst_28 = arith.constant 0.000000e+00 : f32
    %77 = vector.broadcast %cst_28 : f32 to vector<8x1024xf32>
    %78 = vector.shape_cast %76 : vector<1x1024xi1> to vector<1x1024xi1>
    %79 = vector.broadcast %78 : vector<1x1024xi1> to vector<8x1024xi1>
    %80 = arith.select %79, %71, %77 : vector<8x1024xi1>, vector<8x1024xf32>
    %c64 = arith.constant 64 : index
    %c0_29 = arith.constant 0 : index
    %81 = vector.load %arg8[%c64, %c0_29] : memref<224x1024xf32, #tpu.memory_space<vmem>>, vector<8x1024xf32>
    tpu.vector_store %arg8[%c64, %c0_29], %80 {strides = array<i32>} : memref<224x1024xf32, #tpu.memory_space<vmem>>, vector<8x1024xf32>,
    %c0_30 = arith.constant 0 : index
    %c0_31 = arith.constant 0 : index
    %c0_32 = arith.constant 0 : index
    %82 = vector.load %arg2[%c0_30, %c0_31, %c0_32] : memref<1x8x1024xf32, #tpu.memory_space<vmem>>, vector<1x8x1024xf32>
    %83 = vector.shape_cast %82 : vector<1x8x1024xf32> to vector<8x1024xf32>
    %c396_i32 = arith.constant 396 : i32
    %84 = tpu.dynamic_rotate %83 by %c396_i32 dim 1 : vector<8x1024xf32>, i32 -> vector<8x1024xf32>
    %c384_i32 = arith.constant 384 : i32
    %85 = vector.broadcast %c384_i32 : i32 to vector<1x1024xi32>
    %86 = arith.cmpi sge, %0, %85 : vector<1x1024xi32>
    %c12_i32 = arith.constant 12 : i32
    %87 = vector.broadcast %c12_i32 : i32 to vector<1x1024xi32>
    %88 = arith.cmpi sge, %2, %87 : vector<1x1024xi32>
    %89 = arith.andi %86, %88 : vector<1x1024xi1>
    %cst_33 = arith.constant 0.000000e+00 : f32
    %90 = vector.broadcast %cst_33 : f32 to vector<8x1024xf32>
    %91 = vector.shape_cast %89 : vector<1x1024xi1> to vector<1x1024xi1>
    %92 = vector.broadcast %91 : vector<1x1024xi1> to vector<8x1024xi1>
    %93 = arith.select %92, %84, %90 : vector<8x1024xi1>, vector<8x1024xf32>
    %c72 = arith.constant 72 : index
    %c0_34 = arith.constant 0 : index
    %94 = vector.load %arg8[%c72, %c0_34] : memref<224x1024xf32, #tpu.memory_space<vmem>>, vector<8x1024xf32>
    tpu.vector_store %arg8[%c72, %c0_34], %93 {strides = array<i32>} : memref<224x1024xf32, #tpu.memory_space<vmem>>, vector<8x1024xf32>,
    %c384_i32_35 = arith.constant 384 : i32
    %95 = tpu.dynamic_rotate %83 by %c384_i32_35 dim 1 : vector<8x1024xf32>, i32 -> vector<8x1024xf32>
    %c384_i32_36 = arith.constant 384 : i32
    %96 = vector.broadcast %c384_i32_36 : i32 to vector<1x1024xi32>
    %97 = arith.cmpi sge, %0, %96 : vector<1x1024xi32>
    %cst_37 = arith.constant 0.000000e+00 : f32
    %98 = vector.broadcast %cst_37 : f32 to vector<8x1024xf32>
    %99 = vector.shape_cast %97 : vector<1x1024xi1> to vector<1x1024xi1>
    %100 = vector.broadcast %99 : vector<1x1024xi1> to vector<8x1024xi1>
    %101 = arith.select %100, %95, %98 : vector<8x1024xi1>, vector<8x1024xf32>
    %c80 = arith.constant 80 : index
    %c0_38 = arith.constant 0 : index
    %102 = vector.load %arg8[%c80, %c0_38] : memref<224x1024xf32, #tpu.memory_space<vmem>>, vector<8x1024xf32>
    tpu.vector_store %arg8[%c80, %c0_38], %101 {strides = array<i32>} : memref<224x1024xf32, #tpu.memory_space<vmem>>, vector<8x1024xf32>,
    %c372_i32 = arith.constant 372 : i32
    %103 = tpu.dynamic_rotate %83 by %c372_i32 dim 1 : vector<8x1024xf32>, i32 -> vector<8x1024xf32>
    %c384_i32_39 = arith.constant 384 : i32
    %104 = vector.broadcast %c384_i32_39 : i32 to vector<1x1024xi32>
    %105 = arith.cmpi sge, %0, %104 : vector<1x1024xi32>
    %c20_i32 = arith.constant 20 : i32
    %106 = vector.broadcast %c20_i32 : i32 to vector<1x1024xi32>
    %107 = arith.cmpi slt, %2, %106 : vector<1x1024xi32>
    %108 = arith.andi %105, %107 : vector<1x1024xi1>
    %cst_40 = arith.constant 0.000000e+00 : f32
    %109 = vector.broadcast %cst_40 : f32 to vector<8x1024xf32>
    %110 = vector.shape_cast %108 : vector<1x1024xi1> to vector<1x1024xi1>
    %111 = vector.broadcast %110 : vector<1x1024xi1> to vector<8x1024xi1>
    %112 = arith.select %111, %103, %109 : vector<8x1024xi1>, vector<8x1024xf32>
    %c88 = arith.constant 88 : index
    %c0_41 = arith.constant 0 : index
    %113 = vector.load %arg8[%c88, %c0_41] : memref<224x1024xf32, #tpu.memory_space<vmem>>, vector<8x1024xf32>
    tpu.vector_store %arg8[%c88, %c0_41], %112 {strides = array<i32>} : memref<224x1024xf32, #tpu.memory_space<vmem>>, vector<8x1024xf32>,
    %c12_i32_42 = arith.constant 12 : i32
    %114 = tpu.dynamic_rotate %83 by %c12_i32_42 dim 1 : vector<8x1024xf32>, i32 -> vector<8x1024xf32>
    %c12_i32_43 = arith.constant 12 : i32
    %115 = vector.broadcast %c12_i32_43 : i32 to vector<1x1024xi32>
    %116 = arith.cmpi sge, %2, %115 : vector<1x1024xi32>
    %cst_44 = arith.constant 0.000000e+00 : f32
    %117 = vector.broadcast %cst_44 : f32 to vector<8x1024xf32>
    %118 = vector.shape_cast %116 : vector<1x1024xi1> to vector<1x1024xi1>
    %119 = vector.broadcast %118 : vector<1x1024xi1> to vector<8x1024xi1>
    %120 = arith.select %119, %114, %117 : vector<8x1024xi1>, vector<8x1024xf32>
    %c96 = arith.constant 96 : index
    %c0_45 = arith.constant 0 : index
    %121 = vector.load %arg8[%c96, %c0_45] : memref<224x1024xf32, #tpu.memory_space<vmem>>, vector<8x1024xf32>
    tpu.vector_store %arg8[%c96, %c0_45], %120 {strides = array<i32>} : memref<224x1024xf32, #tpu.memory_space<vmem>>, vector<8x1024xf32>,
    %c104 = arith.constant 104 : index
    %c0_46 = arith.constant 0 : index
    %122 = vector.load %arg8[%c104, %c0_46] : memref<224x1024xf32, #tpu.memory_space<vmem>>, vector<8x1024xf32>
    tpu.vector_store %arg8[%c104, %c0_46], %83 {strides = array<i32>} : memref<224x1024xf32, #tpu.memory_space<vmem>>, vector<8x1024xf32>,
    %c1012_i32 = arith.constant 1012 : i32
    %123 = tpu.dynamic_rotate %83 by %c1012_i32 dim 1 : vector<8x1024xf32>, i32 -> vector<8x1024xf32>
    %c20_i32_47 = arith.constant 20 : i32
    %124 = vector.broadcast %c20_i32_47 : i32 to vector<1x1024xi32>
    %125 = arith.cmpi slt, %2, %124 : vector<1x1024xi32>
    %cst_48 = arith.constant 0.000000e+00 : f32
    %126 = vector.broadcast %cst_48 : f32 to vector<8x1024xf32>
    %127 = vector.shape_cast %125 : vector<1x1024xi1> to vector<1x1024xi1>
    %128 = vector.broadcast %127 : vector<1x1024xi1> to vector<8x1024xi1>
    %129 = arith.select %128, %123, %126 : vector<8x1024xi1>, vector<8x1024xf32>
    %c112 = arith.constant 112 : index
    %c0_49 = arith.constant 0 : index
    %130 = vector.load %arg8[%c112, %c0_49] : memref<224x1024xf32, #tpu.memory_space<vmem>>, vector<8x1024xf32>
    tpu.vector_store %arg8[%c112, %c0_49], %129 {strides = array<i32>} : memref<224x1024xf32, #tpu.memory_space<vmem>>, vector<8x1024xf32>,
    %c652_i32 = arith.constant 652 : i32
    %131 = tpu.dynamic_rotate %83 by %c652_i32 dim 1 : vector<8x1024xf32>, i32 -> vector<8x1024xf32>
    %c640_i32 = arith.constant 640 : i32
    %132 = vector.broadcast %c640_i32 : i32 to vector<1x1024xi32>
    %133 = arith.cmpi slt, %0, %132 : vector<1x1024xi32>
    %c12_i32_50 = arith.constant 12 : i32
    %134 = vector.broadcast %c12_i32_50 : i32 to vector<1x1024xi32>
    %135 = arith.cmpi sge, %2, %134 : vector<1x1024xi32>
    %136 = arith.andi %133, %135 : vector<1x1024xi1>
    %cst_51 = arith.constant 0.000000e+00 : f32
    %137 = vector.broadcast %cst_51 : f32 to vector<8x1024xf32>
    %138 = vector.shape_cast %136 : vector<1x1024xi1> to vector<1x1024xi1>
    %139 = vector.broadcast %138 : vector<1x1024xi1> to vector<8x1024xi1>
    %140 = arith.select %139, %131, %137 : vector<8x1024xi1>, vector<8x1024xf32>
    %c120 = arith.constant 120 : index
    %c0_52 = arith.constant 0 : index
    %141 = vector.load %arg8[%c120, %c0_52] : memref<224x1024xf32, #tpu.memory_space<vmem>>, vector<8x1024xf32>
    tpu.vector_store %arg8[%c120, %c0_52], %140 {strides = array<i32>} : memref<224x1024xf32, #tpu.memory_space<vmem>>, vector<8x1024xf32>,
    %c640_i32_53 = arith.constant 640 : i32
    %142 = tpu.dynamic_rotate %83 by %c640_i32_53 dim 1 : vector<8x1024xf32>, i32 -> vector<8x1024xf32>
    %c640_i32_54 = arith.constant 640 : i32
    %143 = vector.broadcast %c640_i32_54 : i32 to vector<1x1024xi32>
    %144 = arith.cmpi slt, %0, %143 : vector<1x1024xi32>
    %cst_55 = arith.constant 0.000000e+00 : f32
    %145 = vector.broadcast %cst_55 : f32 to vector<8x1024xf32>
    %146 = vector.shape_cast %144 : vector<1x1024xi1> to vector<1x1024xi1>
    %147 = vector.broadcast %146 : vector<1x1024xi1> to vector<8x1024xi1>
    %148 = arith.select %147, %142, %145 : vector<8x1024xi1>, vector<8x1024xf32>
    %c128 = arith.constant 128 : index
    %c0_56 = arith.constant 0 : index
    %149 = vector.load %arg8[%c128, %c0_56] : memref<224x1024xf32, #tpu.memory_space<vmem>>, vector<8x1024xf32>
    tpu.vector_store %arg8[%c128, %c0_56], %148 {strides = array<i32>} : memref<224x1024xf32, #tpu.memory_space<vmem>>, vector<8x1024xf32>,
    %c628_i32 = arith.constant 628 : i32
    %150 = tpu.dynamic_rotate %83 by %c628_i32 dim 1 : vector<8x1024xf32>, i32 -> vector<8x1024xf32>
    %c640_i32_57 = arith.constant 640 : i32
    %151 = vector.broadcast %c640_i32_57 : i32 to vector<1x1024xi32>
    %152 = arith.cmpi slt, %0, %151 : vector<1x1024xi32>
    %c20_i32_58 = arith.constant 20 : i32
    %153 = vector.broadcast %c20_i32_58 : i32 to vector<1x1024xi32>
    %154 = arith.cmpi slt, %2, %153 : vector<1x1024xi32>
    %155 = arith.andi %152, %154 : vector<1x1024xi1>
    %cst_59 = arith.constant 0.000000e+00 : f32
    %156 = vector.broadcast %cst_59 : f32 to vector<8x1024xf32>
    %157 = vector.shape_cast %155 : vector<1x1024xi1> to vector<1x1024xi1>
    %158 = vector.broadcast %157 : vector<1x1024xi1> to vector<8x1024xi1>
    %159 = arith.select %158, %150, %156 : vector<8x1024xi1>, vector<8x1024xf32>
    %c136 = arith.constant 136 : index
    %c0_60 = arith.constant 0 : index
    %160 = vector.load %arg8[%c136, %c0_60] : memref<224x1024xf32, #tpu.memory_space<vmem>>, vector<8x1024xf32>
    tpu.vector_store %arg8[%c136, %c0_60], %159 {strides = array<i32>} : memref<224x1024xf32, #tpu.memory_space<vmem>>, vector<8x1024xf32>,
    %c0_61 = arith.constant 0 : index
    %c0_62 = arith.constant 0 : index
    %c0_63 = arith.constant 0 : index
    %161 = vector.load %arg3[%c0_61, %c0_62, %c0_63] : memref<1x8x1024xf32, #tpu.memory_space<vmem>>, vector<1x8x1024xf32>
    %162 = vector.shape_cast %161 : vector<1x8x1024xf32> to vector<8x1024xf32>
    %c198_i32 = arith.constant 198 : i32
    %163 = tpu.dynamic_rotate %162 by %c198_i32 dim 1 : vector<8x1024xf32>, i32 -> vector<8x1024xf32>
    %c192_i32 = arith.constant 192 : i32
    %164 = vector.broadcast %c192_i32 : i32 to vector<1x1024xi32>
    %165 = arith.cmpi sge, %0, %164 : vector<1x1024xi32>
    %c6_i32 = arith.constant 6 : i32
    %166 = vector.broadcast %c6_i32 : i32 to vector<1x1024xi32>
    %167 = arith.cmpi sge, %2, %166 : vector<1x1024xi32>
    %168 = arith.andi %165, %167 : vector<1x1024xi1>
    %cst_64 = arith.constant 0.000000e+00 : f32
    %169 = vector.broadcast %cst_64 : f32 to vector<8x1024xf32>
    %170 = vector.shape_cast %168 : vector<1x1024xi1> to vector<1x1024xi1>
    %171 = vector.broadcast %170 : vector<1x1024xi1> to vector<8x1024xi1>
    %172 = arith.select %171, %163, %169 : vector<8x1024xi1>, vector<8x1024xf32>
    %c144 = arith.constant 144 : index
    %c0_65 = arith.constant 0 : index
    %173 = vector.load %arg8[%c144, %c0_65] : memref<224x1024xf32, #tpu.memory_space<vmem>>, vector<8x1024xf32>
    tpu.vector_store %arg8[%c144, %c0_65], %172 {strides = array<i32>} : memref<224x1024xf32, #tpu.memory_space<vmem>>, vector<8x1024xf32>,
    %c192_i32_66 = arith.constant 192 : i32
    %174 = tpu.dynamic_rotate %162 by %c192_i32_66 dim 1 : vector<8x1024xf32>, i32 -> vector<8x1024xf32>
    %c192_i32_67 = arith.constant 192 : i32
    %175 = vector.broadcast %c192_i32_67 : i32 to vector<1x1024xi32>
    %176 = arith.cmpi sge, %0, %175 : vector<1x1024xi32>
    %cst_68 = arith.constant 0.000000e+00 : f32
    %177 = vector.broadcast %cst_68 : f32 to vector<8x1024xf32>
    %178 = vector.shape_cast %176 : vector<1x1024xi1> to vector<1x1024xi1>
    %179 = vector.broadcast %178 : vector<1x1024xi1> to vector<8x1024xi1>
    %180 = arith.select %179, %174, %177 : vector<8x1024xi1>, vector<8x1024xf32>
    %c152 = arith.constant 152 : index
    %c0_69 = arith.constant 0 : index
    %181 = vector.load %arg8[%c152, %c0_69] : memref<224x1024xf32, #tpu.memory_space<vmem>>, vector<8x1024xf32>
    tpu.vector_store %arg8[%c152, %c0_69], %180 {strides = array<i32>} : memref<224x1024xf32, #tpu.memory_space<vmem>>, vector<8x1024xf32>,
    %c186_i32 = arith.constant 186 : i32
    %182 = tpu.dynamic_rotate %162 by %c186_i32 dim 1 : vector<8x1024xf32>, i32 -> vector<8x1024xf32>
    %c192_i32_70 = arith.constant 192 : i32
    %183 = vector.broadcast %c192_i32_70 : i32 to vector<1x1024xi32>
    %184 = arith.cmpi sge, %0, %183 : vector<1x1024xi32>
    %c26_i32 = arith.constant 26 : i32
    %185 = vector.broadcast %c26_i32 : i32 to vector<1x1024xi32>
    %186 = arith.cmpi slt, %2, %185 : vector<1x1024xi32>
    %187 = arith.andi %184, %186 : vector<1x1024xi1>
    %cst_71 = arith.constant 0.000000e+00 : f32
    %188 = vector.broadcast %cst_71 : f32 to vector<8x1024xf32>
    %189 = vector.shape_cast %187 : vector<1x1024xi1> to vector<1x1024xi1>
    %190 = vector.broadcast %189 : vector<1x1024xi1> to vector<8x1024xi1>
    %191 = arith.select %190, %182, %188 : vector<8x1024xi1>, vector<8x1024xf32>
    %c160 = arith.constant 160 : index
    %c0_72 = arith.constant 0 : index
    %192 = vector.load %arg8[%c160, %c0_72] : memref<224x1024xf32, #tpu.memory_space<vmem>>, vector<8x1024xf32>
    tpu.vector_store %arg8[%c160, %c0_72], %191 {strides = array<i32>} : memref<224x1024xf32, #tpu.memory_space<vmem>>, vector<8x1024xf32>,
    %c6_i32_73 = arith.constant 6 : i32
    %193 = tpu.dynamic_rotate %162 by %c6_i32_73 dim 1 : vector<8x1024xf32>, i32 -> vector<8x1024xf32>
    %c6_i32_74 = arith.constant 6 : i32
    %194 = vector.broadcast %c6_i32_74 : i32 to vector<1x1024xi32>
    %195 = arith.cmpi sge, %2, %194 : vector<1x1024xi32>
    %cst_75 = arith.constant 0.000000e+00 : f32
    %196 = vector.broadcast %cst_75 : f32 to vector<8x1024xf32>
    %197 = vector.shape_cast %195 : vector<1x1024xi1> to vector<1x1024xi1>
    %198 = vector.broadcast %197 : vector<1x1024xi1> to vector<8x1024xi1>
    %199 = arith.select %198, %193, %196 : vector<8x1024xi1>, vector<8x1024xf32>
    %c168 = arith.constant 168 : index
    %c0_76 = arith.constant 0 : index
    %200 = vector.load %arg8[%c168, %c0_76] : memref<224x1024xf32, #tpu.memory_space<vmem>>, vector<8x1024xf32>
    tpu.vector_store %arg8[%c168, %c0_76], %199 {strides = array<i32>} : memref<224x1024xf32, #tpu.memory_space<vmem>>, vector<8x1024xf32>,
    %c176 = arith.constant 176 : index
    %c0_77 = arith.constant 0 : index
    %201 = vector.load %arg8[%c176, %c0_77] : memref<224x1024xf32, #tpu.memory_space<vmem>>, vector<8x1024xf32>
    tpu.vector_store %arg8[%c176, %c0_77], %162 {strides = array<i32>} : memref<224x1024xf32, #tpu.memory_space<vmem>>, vector<8x1024xf32>,
    %c1018_i32 = arith.constant 1018 : i32
    %202 = tpu.dynamic_rotate %162 by %c1018_i32 dim 1 : vector<8x1024xf32>, i32 -> vector<8x1024xf32>
    %c26_i32_78 = arith.constant 26 : i32
    %203 = vector.broadcast %c26_i32_78 : i32 to vector<1x1024xi32>
    %204 = arith.cmpi slt, %2, %203 : vector<1x1024xi32>
    %cst_79 = arith.constant 0.000000e+00 : f32
    %205 = vector.broadcast %cst_79 : f32 to vector<8x1024xf32>
    %206 = vector.shape_cast %204 : vector<1x1024xi1> to vector<1x1024xi1>
    %207 = vector.broadcast %206 : vector<1x1024xi1> to vector<8x1024xi1>
    %208 = arith.select %207, %202, %205 : vector<8x1024xi1>, vector<8x1024xf32>
    %c184 = arith.constant 184 : index
    %c0_80 = arith.constant 0 : index
    %209 = vector.load %arg8[%c184, %c0_80] : memref<224x1024xf32, #tpu.memory_space<vmem>>, vector<8x1024xf32>
    tpu.vector_store %arg8[%c184, %c0_80], %208 {strides = array<i32>} : memref<224x1024xf32, #tpu.memory_space<vmem>>, vector<8x1024xf32>,
    %c838_i32 = arith.constant 838 : i32
    %210 = tpu.dynamic_rotate %162 by %c838_i32 dim 1 : vector<8x1024xf32>, i32 -> vector<8x1024xf32>
    %c832_i32 = arith.constant 832 : i32
    %211 = vector.broadcast %c832_i32 : i32 to vector<1x1024xi32>
    %212 = arith.cmpi slt, %0, %211 : vector<1x1024xi32>
    %c6_i32_81 = arith.constant 6 : i32
    %213 = vector.broadcast %c6_i32_81 : i32 to vector<1x1024xi32>
    %214 = arith.cmpi sge, %2, %213 : vector<1x1024xi32>
    %215 = arith.andi %212, %214 : vector<1x1024xi1>
    %cst_82 = arith.constant 0.000000e+00 : f32
    %216 = vector.broadcast %cst_82 : f32 to vector<8x1024xf32>
    %217 = vector.shape_cast %215 : vector<1x1024xi1> to vector<1x1024xi1>
    %218 = vector.broadcast %217 : vector<1x1024xi1> to vector<8x1024xi1>
    %219 = arith.select %218, %210, %216 : vector<8x1024xi1>, vector<8x1024xf32>
    %c192 = arith.constant 192 : index
    %c0_83 = arith.constant 0 : index
    %220 = vector.load %arg8[%c192, %c0_83] : memref<224x1024xf32, #tpu.memory_space<vmem>>, vector<8x1024xf32>
    tpu.vector_store %arg8[%c192, %c0_83], %219 {strides = array<i32>} : memref<224x1024xf32, #tpu.memory_space<vmem>>, vector<8x1024xf32>,
    %c832_i32_84 = arith.constant 832 : i32
    %221 = tpu.dynamic_rotate %162 by %c832_i32_84 dim 1 : vector<8x1024xf32>, i32 -> vector<8x1024xf32>
    %c832_i32_85 = arith.constant 832 : i32
    %222 = vector.broadcast %c832_i32_85 : i32 to vector<1x1024xi32>
    %223 = arith.cmpi slt, %0, %222 : vector<1x1024xi32>
    %cst_86 = arith.constant 0.000000e+00 : f32
    %224 = vector.broadcast %cst_86 : f32 to vector<8x1024xf32>
    %225 = vector.shape_cast %223 : vector<1x1024xi1> to vector<1x1024xi1>
    %226 = vector.broadcast %225 : vector<1x1024xi1> to vector<8x1024xi1>
    %227 = arith.select %226, %221, %224 : vector<8x1024xi1>, vector<8x1024xf32>
    %c200 = arith.constant 200 : index
    %c0_87 = arith.constant 0 : index
    %228 = vector.load %arg8[%c200, %c0_87] : memref<224x1024xf32, #tpu.memory_space<vmem>>, vector<8x1024xf32>
    tpu.vector_store %arg8[%c200, %c0_87], %227 {strides = array<i32>} : memref<224x1024xf32, #tpu.memory_space<vmem>>, vector<8x1024xf32>,
    %c826_i32 = arith.constant 826 : i32
    %229 = tpu.dynamic_rotate %162 by %c826_i32 dim 1 : vector<8x1024xf32>, i32 -> vector<8x1024xf32>
    %c832_i32_88 = arith.constant 832 : i32
    %230 = vector.broadcast %c832_i32_88 : i32 to vector<1x1024xi32>
    %231 = arith.cmpi slt, %0, %230 : vector<1x1024xi32>
    %c26_i32_89 = arith.constant 26 : i32
    %232 = vector.broadcast %c26_i32_89 : i32 to vector<1x1024xi32>
    %233 = arith.cmpi slt, %2, %232 : vector<1x1024xi32>
    %234 = arith.andi %231, %233 : vector<1x1024xi1>
    %cst_90 = arith.constant 0.000000e+00 : f32
    %235 = vector.broadcast %cst_90 : f32 to vector<8x1024xf32>
    %236 = vector.shape_cast %234 : vector<1x1024xi1> to vector<1x1024xi1>
    %237 = vector.broadcast %236 : vector<1x1024xi1> to vector<8x1024xi1>
    %238 = arith.select %237, %229, %235 : vector<8x1024xi1>, vector<8x1024xf32>
    %c208 = arith.constant 208 : index
    %c0_91 = arith.constant 0 : index
    %239 = vector.load %arg8[%c208, %c0_91] : memref<224x1024xf32, #tpu.memory_space<vmem>>, vector<8x1024xf32>
    tpu.vector_store %arg8[%c208, %c0_91], %238 {strides = array<i32>} : memref<224x1024xf32, #tpu.memory_space<vmem>>, vector<8x1024xf32>,
    %c0_92 = arith.constant 0 : index
    %c0_93 = arith.constant 0 : index
    %c0_94 = arith.constant 0 : index
    %240 = vector.load %arg4[%c0_92, %c0_93, %c0_94] : memref<1x8x1024xf32, #tpu.memory_space<vmem>>, vector<1x8x1024xf32>
    %241 = vector.shape_cast %240 : vector<1x8x1024xf32> to vector<8x1024xf32>
    %c216 = arith.constant 216 : index
    %c0_95 = arith.constant 0 : index
    %242 = vector.load %arg8[%c216, %c0_95] : memref<224x1024xf32, #tpu.memory_space<vmem>>, vector<8x1024xf32>
    tpu.vector_store %arg8[%c216, %c0_95], %241 {strides = array<i32>} : memref<224x1024xf32, #tpu.memory_space<vmem>>, vector<8x1024xf32>,
    %c0_96 = arith.constant 0 : index
    %c0_97 = arith.constant 0 : index
    %243 = vector.load %arg5[%c0_96, %c0_97] : memref<8x224xf32, #tpu.memory_space<vmem>>, vector<8x224xf32>
    %c0_98 = arith.constant 0 : index
    %c0_99 = arith.constant 0 : index
    %244 = vector.load %arg8[%c0_98, %c0_99] : memref<224x1024xf32, #tpu.memory_space<vmem>>, vector<224x1024xf32>
    %cst_100 = arith.constant dense<0.000000e+00> : vector<8x1024xf32>
    %245 = tpu.matmul %243, %244, %cst_100 {dimension_numbers = #tpu.dot_dimension_numbers<[1], [0], [0], [1], [0, 0, 1, 1], [], []>} : vector<8x224xf32>, vector<224x1024xf32>, vector<8x1024xf32> -> vector<8x1024xf32>
    %c0_101 = arith.constant 0 : index
    %c0_102 = arith.constant 0 : index
    %246 = vector.load %arg6[%c0_101, %c0_102] : memref<8x1xf32, #tpu.memory_space<vmem>>, vector<8x1xf32>
    %247 = vector.broadcast %246 : vector<8x1xf32> to vector<8x1024xf32>
    %248 = arith.addf %245, %247 : vector<8x1024xf32>
    %c0_103 = arith.constant 0 : index
    %c0_104 = arith.constant 0 : index
    %c0_105 = arith.constant 0 : index
    %249 = vector.load %arg7[%c0_103, %c0_104, %c0_105] : memref<1x8x1024xf32, #tpu.memory_space<vmem>>, vector<1x8x1024xf32>
    %250 = vector.shape_cast %249 : vector<1x8x1024xf32> to vector<8x1024xf32>
    %251 = vector.shape_cast %248 : vector<8x1024xf32> to vector<1x8x1024xf32>
    tpu.vector_store %arg7[%c0_103, %c0_104, %c0_105], %251 {strides = array<i32>} : memref<1x8x1024xf32, #tpu.memory_space<vmem>>, vector<1x8x1024xf32>,
    return
  }
  func.func @transform_0(%arg0: i32) -> (i32, i32, i32) {
    %c0_i32 = arith.constant 0 : i32
    %c0_i32_0 = arith.constant 0 : i32
    %c0_i32_1 = arith.constant 0 : i32
    return %arg0, %c0_i32, %c0_i32_0 : i32, i32, i32
  }
  func.func @transform_1(%arg0: i32) -> (i32, i32, i32) {
    %c0_i32 = arith.constant 0 : i32
    %c0_i32_0 = arith.constant 0 : i32
    %c0_i32_1 = arith.constant 0 : i32
    return %arg0, %c0_i32, %c0_i32_0 : i32, i32, i32
  }
  func.func @transform_2(%arg0: i32) -> (i32, i32, i32) {
    %c0_i32 = arith.constant 0 : i32
    %c0_i32_0 = arith.constant 0 : i32
    %c0_i32_1 = arith.constant 0 : i32
    return %arg0, %c0_i32, %c0_i32_0 : i32, i32, i32
  }
  func.func @transform_3(%arg0: i32) -> (i32, i32, i32) {
    %c0_i32 = arith.constant 0 : i32
    %c0_i32_0 = arith.constant 0 : i32
    %c0_i32_1 = arith.constant 0 : i32
    return %arg0, %c0_i32, %c0_i32_0 : i32, i32, i32
  }
  func.func @transform_4(%arg0: i32) -> (i32, i32) {
    %c0_i32 = arith.constant 0 : i32
    %c0_i32_0 = arith.constant 0 : i32
    %c0_i32_1 = arith.constant 0 : i32
    return %c0_i32, %c0_i32_0 : i32, i32
  }
  func.func @transform_5(%arg0: i32) -> (i32, i32) {
    %c0_i32 = arith.constant 0 : i32
    %c0_i32_0 = arith.constant 0 : i32
    %c0_i32_1 = arith.constant 0 : i32
    return %c0_i32, %c0_i32_0 : i32, i32
  }
  func.func @transform_6(%arg0: i32) -> (i32, i32, i32) {
    %c0_i32 = arith.constant 0 : i32
    %c0_i32_0 = arith.constant 0 : i32
    %c0_i32_1 = arith.constant 0 : i32
    return %arg0, %c0_i32, %c0_i32_0 : i32, i32, i32
  }
}

</mosaic_0001>

<bundles_post_ra>
// kernel: tpu_custom_call.1
= control target key start
LH: loop header
LB: loop body
LE: loop exit
PB: predicated region body
PF: predicated region fallthrough
CT: control target
= control target key end

     0   :  { %s5097_s0 = inlined_call_operand.hbm [shape: f32[2,8,1024], index: 0, kind: input, shape index: {}]   ;;  %s5098_s1 = inlined_call_operand.hbm [shape: f32[2,8,1024], index: 1, kind: input, shape index: {}]   ;;  %s5099_s2 = inlined_call_operand.hbm [shape: f32[2,8,1024], index: 2, kind: input, shape index: {}]   ;;  %s5100_s3 = inlined_call_operand.hbm [shape: f32[2,8,1024], index: 3, kind: input, shape index: {}]   ;;  %s5101_s4 = inlined_call_operand.vmem [shape: f32[8,224], index: 4, kind: input, shape index: {}]   ;;  %s5102_s5 = inlined_call_operand.vmem [shape: f32[8,1], index: 5, kind: input, shape index: {}]   ;;  %s5103_s6 = inlined_call_operand.hbm [shape: f32[2,8,1024], index: 6, kind: output, shape index: {}]  }
   0x1   :  { %5144 = sst [smem:[#allocation26_spill]] %s5098_s1 }
   0x2   :  { %11 = vsyncpa [#allocation4], 0 }
   0x3   :  { %13 = vsyncpa [#allocation4 + $0x1], 0 }
   0x4   :  { %14 = vsyncpa [#allocation7], 0 }
   0x5   :  { %16 = vsyncpa [#allocation7 + $0x1], 0 }
   0x6   :  { %17 = vsyncpa [#allocation10], 0 }
   0x7   :  { %19 = vsyncpa [#allocation10 + $0x1], 0 }
   0x8   :  { %20 = vsyncpa [#allocation5], 0 }
   0x9   :  { %22 = vsyncpa [#allocation5 + $0x1], 0  ;;  %s3438_s21 = smov 0   ;;  %s3440_s22 = smov 0  }
   0xa   :  { %s3442_s23 = smov 0   ;;  %s3444_s24 = smov 0  }
   0xb LB: > { %5145 = sst [smem:[#allocation16_spill]] %s3377_s23  ;;  %s3459_s25 = sadd.s32 4294967295, %s3381_s24   ;;  %s3381_s24 = sphi %s3444_s24, %s5303_s24   ;;  %s3377_s23 = sphi %s3442_s23, %s5305_s23   ;;  %s3373_s22 = sphi %s3440_s22, %s5307_s22   ;;  %s3369_s21 = sphi %s3438_s21, %s5306_s21  }
   0xc   : > { %5146 = sst [smem:[#allocation17_spill]] %s3381_s24  ;;  %s2446_s26 = sadd.s32 4294967294, %s3381_s24  }
   0xd   : > { %s3463_s27 = sadd.s32 1, %s3381_s24   ;;  %s35_s28 = sadd.s32 1, %s3377_s23 }
   0xe   : > { %5147 = sst [smem:[#allocation18_spill]] %s3463_s27  ;;  %s32_s29 = ssub.s32 %s3381_s24, %s3463_s27 }
   0xf   : > { %p42_p0 = scmp.ne.s32.totalorder %s3377_s23, %s3373_s22  ;;  %p33_p1 = scmp.eq.s32.totalorder %s32_s29, 0 }
  0x10   : > { %p43_p2 = scmp.eq.s32.totalorder %s3381_s24, 0  ;;  %p48_p3 = scmp.ne.s32.totalorder %s3373_s22, %s3369_s21 }
  0x11   : > { %p49_p4 = scmp.eq.s32.totalorder %s3459_s25, 0  ;;  %p192_p7 = scmp.eq.s32.totalorder %s3459_s25, 1 }
  0x12   : > { %s3475_s30 = scalar_select %p33_p1, %s3377_s23, %s35_s28  }
  0x13   : > { %p44_p5 = por %p43_p2, %p42_p0  ;;  %p3477_p6 = por %p49_p4, %p48_p3 }
  0x14   : > { %5148 = sst [smem:[#allocation19_spill]] %s3475_s30  ;;  %p198_p8 = scmp.eq.s32.totalorder %s2446_s26, 1 }
  0x15   : > { %s5149_s7 = scalar_select %p3477_p6, 1, 0 }
  0x16   : > { %p2927_p10 = scmp.lt.s32.totalorder %s3381_s24, 2  ;;  %p3484_p11 = por %p192_p7, %p42_p0 }
  0x17   : > { %p3488_p12 = por %p198_p8, %p48_p3  ;;  %s3493_s10 = sand.u32 1, %s3377_s23  }
  0x18   : > { %s5150_s8 = scalar_select %p3484_p11, 1, 0 }
  0x19   : > { %s5151_s9 = scalar_select %p3488_p12, 1, 0 }
  0x1a   : > { %s3496_s11 = sshll.u32 %s3381_s24, 10  ;;  %s3499_s12 = sshll.u32 %s3493_s10, 6 }
  0x1b   : > { %p3501_p13 = pnand %p2927_p10, %p44_p5  ;;  %s243_s14 = sand.u32 1, %s3381_s24  }
  0x1c   : > { %s5153_s1 = sld [smem:[#allocation26_spill]]  ;;  %s247_s18 = scalar_lea.vmem [#allocation6], %s3499_s12 }
  0x1d   : > { %s5152_s13 = scalar_select %p3501_p13, 1, 0 }
  0x1e   : > { %s255_s19 = sshll.u32 %s247_s18, 4  ;;  %s3516_s20 = scalar_lea.sflag [#allocation7], %s243_s14  ;;  %s3513_s19 = int_to_ptr.vmem [resolvable:$true] %s255_s19 }
  0x1f   : > { %p3522_p2 = pneg %p3501_p13 }
  0x22   : > { %s3510_s17 = scalar_lea.hbm %s5153_s1, %s3496_s11  ;;  %s3192_s16 = scalar_lea.hbm %s5153_s1, 2048 }
  0x23   : > { %s3187_s26 = scalar_lea.hbm %s3510_s17, 1024  ;;  %p3193_p5 = scmp.lt.u32.totalorder %s3510_s17, %s5153_s1 }
  0x24   : > { %p3188_p1 = scmp.ne.s32.totalorder %s3510_s17, %s3187_s26  ;;  %p3194_p7 = scmp.lt.u32.totalorder %s3192_s16, %s3187_s26 }
  0x25   : > { %p3196_p10 = scmp.lt.u32.totalorder %s3187_s26, %s3510_s17 }
  0x26   : > { %p3190_p3 = pnand %p3522_p2, %p3188_p1  ;;  %p3195_p8 = por %p3194_p7, %p3193_p5 }
  0x28   : > { %p3191_p4 = pneg %p3190_p3  ;;  %p3197_p9 = por %p3196_p10, %p3195_p8 }
  0x2a   : > { %p3198_p0 = pnand %p3197_p9, %p3191_p4 }
  0x2c   : > { %3201 = shalt.err (!%p3198_p0)
}
  0x2d   : > { %s3202_s14 = scalar_lea.vmem %s3513_s19, 1024  ;;  %s3383_s29 = smov [#allocation6]  }
  0x2e   : > { %p3203_p1 = scmp.ne.s32.totalorder %s3513_s19, %s3202_s14  ;;  %s3207_s15 = sshll.u32 %s3383_s29, 4  ;;  %s3208_s15 = int_to_ptr.vmem [resolvable:$false] %s3207_s15 }
  0x2f   : > { %s3209_s30 = scalar_lea.vmem %s3208_s15, 2048  ;;  %p3210_p11 = scmp.lt.s32.totalorder %s3513_s19, %s3208_s15 }
  0x30   : > { %p3205_p3 = pnand %p3203_p1, %p3522_p2  ;;  %p3211_p6 = scmp.lt.s32.totalorder %s3209_s30, %s3202_s14 }
  0x32   : > { %p3206_p12 = pneg %p3205_p3  ;;  %p3212_p5 = por %p3211_p6, %p3210_p11 }
  0x34   : > { %p3213_p7 = pnand %p3212_p5, %p3206_p12 }
  0x36   : > { %3216 = shalt.err (!%p3213_p7)
}
  0x37   : > { %2916 = dma.hbm_to_vmem [thread:$0]  (!%p3501_p13), %s3510_s17, 1024, %s3513_s19, %s3516_s20  }
  0x38   : > { %p298_p9 = scmp.lt.s32.totalorder %s3381_s24, 3  ;;  %s3551_s18 = scalar_lea.hbm %s5097_s0, %s3496_s11 }
  0x39   : > { %p5155_p6 = scmp.ge.s32.totalorder %s3381_s24, 1  ;;  %s228_s29 = scalar_lea.vmem [#allocation3], %s3499_s12 }
  0x3a   : > { %s236_s15 = sshll.u32 %s228_s29, 4  ;;  %s225_s30 = scalar_lea.sflag [#allocation4], %s3493_s10  ;;  %s237_s15 = int_to_ptr.vmem [resolvable:$true] %s236_s15 }
  0x3b   : > { %p3555_p11 = pnand %p5155_p6, %p298_p9  ;;  %s3217_s17 = scalar_lea.hbm %s3551_s18, 1024 }
  0x3c   : > { %p3218_p12 = scmp.ne.s32.totalorder %s3551_s18, %s3217_s17  ;;  %s3222_s16 = scalar_lea.hbm %s5097_s0, 2048 }
  0x3d   : > { %s5156_s14 = scalar_select %p3555_p11, 1, 0 }
  0x3e   : > { %p3220_p0 = pnand %p3218_p12, %p3522_p2  ;;  %p3223_p8 = scmp.lt.u32.totalorder %s3551_s18, %s5097_s0 }
  0x3f   : > { %p3224_p10 = scmp.lt.u32.totalorder %s3222_s16, %s3217_s17  ;;  %p3226_p3 = scmp.lt.u32.totalorder %s3217_s17, %s3551_s18 }
  0x40   : > { %p3221_p4 = pneg %p3220_p0 }
  0x41   : > { %p3225_p1 = por %p3224_p10, %p3223_p8 }
  0x43   : > { %p3227_p5 = por %p3226_p3, %p3225_p1 }
  0x45   : > { %p3228_p7 = pnand %p3227_p5, %p3221_p4 }
  0x47   : > { %3231 = shalt.err (!%p3228_p7)
}
  0x48   : > { %s3232_s29 = scalar_lea.vmem %s237_s15, 1024  ;;  %s3384_s27 = smov [#allocation3]  }
  0x49   : > { %p3233_p9 = scmp.ne.s32.totalorder %s237_s15, %s3232_s29  ;;  %s3237_s24 = sshll.u32 %s3384_s27, 4  ;;  %s3238_s24 = int_to_ptr.vmem [resolvable:$false] %s3237_s24 }
  0x4a   : > { %s3239_s19 = scalar_lea.vmem %s3238_s24, 2048  ;;  %p3240_p0 = scmp.lt.s32.totalorder %s237_s15, %s3238_s24 }
  0x4b   : > { %p3235_p6 = pnand %p3233_p9, %p3522_p2  ;;  %p3241_p11 = scmp.lt.s32.totalorder %s3239_s19, %s3232_s29 }
  0x4d   : > { %p3236_p12 = pneg %p3235_p6  ;;  %p3242_p13 = por %p3241_p11, %p3240_p0 }
  0x4f   : > { %p3243_p8 = pnand %p3242_p13, %p3236_p12 }
  0x51   : > { %3246 = shalt.err (!%p3243_p8)
}
  0x52   : > { %p5157_p10 = scmp.ne.s32.totalorder %s5152_s13, 0  ;;  %s3582_s17 = scalar_lea.hbm %s5099_s2, %s3496_s11 }
  0x53   : > { %s266_s24 = scalar_lea.vmem [#allocation8], %s3499_s12  ;;  %s3247_s26 = scalar_lea.hbm %s3582_s17, 1024 }
  0x54   : > { %2913 = dma.hbm_to_vmem [thread:$0]  (!%p5157_p10), %s3551_s18, 1024, %s237_s15, %s225_s30  }
  0x55   : > { %s274_s27 = sshll.u32 %s266_s24, 4  ;;  %p3248_p13 = scmp.ne.s32.totalorder %s3582_s17, %s3247_s26  ;;  %s275_s27 = int_to_ptr.vmem [resolvable:$true] %s274_s27 }
  0x56   : > { %s3252_s18 = scalar_lea.hbm %s5099_s2, 2048  ;;  %p3253_p1 = scmp.lt.u32.totalorder %s3582_s17, %s5099_s2 }
  0x57   : > { %p3250_p11 = pnand %p3248_p13, %p3522_p2  ;;  %p3254_p3 = scmp.lt.u32.totalorder %s3252_s18, %s3247_s26 }
  0x58   : > { %p3256_p7 = scmp.lt.u32.totalorder %s3247_s26, %s3582_s17 }
  0x59   : > { %p3251_p4 = pneg %p3250_p11  ;;  %p3255_p5 = por %p3254_p3, %p3253_p1 }
  0x5b   : > { %p3257_p9 = por %p3256_p7, %p3255_p5 }
  0x5d   : > { %p3258_p6 = pnand %p3257_p9, %p3251_p4 }
  0x5f   : > { %3261 = shalt.err (!%p3258_p6)
}
  0x60   : > { %s3262_s19 = scalar_lea.vmem %s275_s27, 1024  ;;  %s3385_s1 = smov [#allocation8]  }
  0x61   : > { %p3263_p12 = scmp.ne.s32.totalorder %s275_s27, %s3262_s19  ;;  %s3267_s23 = sshll.u32 %s3385_s1, 4  ;;  %s3268_s23 = int_to_ptr.vmem [resolvable:$false] %s3267_s23 }
  0x62   : > { %s3269_s24 = scalar_lea.vmem %s3268_s23, 2048  ;;  %p3270_p13 = scmp.lt.s32.totalorder %s275_s27, %s3268_s23 }
  0x63   : > { %p3265_p0 = pnand %p3263_p12, %p3522_p2  ;;  %p3271_p11 = scmp.lt.s32.totalorder %s3269_s24, %s3262_s19 }
  0x65   : > { %p3266_p8 = pneg %p3265_p0  ;;  %p3272_p10 = por %p3271_p11, %p3270_p13 }
  0x67   : > { %p3273_p1 = pnand %p3272_p10, %p3266_p8 }
  0x69   : > { %3276 = shalt.err (!%p3273_p1)
}
  0x6a   : > { %p5158_p3 = scmp.ne.s32.totalorder %s5152_s13, 0  ;;  %s3607_s29 = scalar_lea.hbm %s5100_s3, %s3496_s11 }
  0x6b   : > { %s285_s18 = scalar_lea.vmem [#allocation9], %s3499_s12  ;;  %s282_s30 = scalar_lea.sflag [#allocation10], %s3493_s10 }
  0x6c   : > { %2919 = dma.hbm_to_vmem [thread:$0]  (!%p5158_p3), %s3582_s17, 1024, %s275_s27, %s3516_s20  }
  0x6d   : > { %s293_s15 = sshll.u32 %s285_s18, 4  ;;  %s3277_s19 = scalar_lea.hbm %s3607_s29, 1024  ;;  %s294_s15 = int_to_ptr.vmem [resolvable:$true] %s293_s15 }
  0x6e   : > { %p3278_p10 = scmp.ne.s32.totalorder %s3607_s29, %s3277_s19  ;;  %s3282_s17 = scalar_lea.hbm %s5100_s3, 2048 }
  0x6f   : > { %p3283_p7 = scmp.lt.u32.totalorder %s3607_s29, %s5100_s3  ;;  %p3284_p9 = scmp.lt.u32.totalorder %s3282_s17, %s3277_s19 }
  0x70   : > { %p3280_p4 = pnand %p3278_p10, %p3522_p2  ;;  %p3286_p12 = scmp.lt.u32.totalorder %s3277_s19, %s3607_s29 }
  0x71   : > { %p3285_p6 = por %p3284_p9, %p3283_p7 }
  0x72   : > { %p3281_p5 = pneg %p3280_p4 }
  0x73   : > { %p3287_p0 = por %p3286_p12, %p3285_p6 }
  0x75   : > { %p3288_p8 = pnand %p3287_p0, %p3281_p5 }
  0x77   : > { %3291 = shalt.err (!%p3288_p8)
}
  0x78   : > { %s3292_s10 = scalar_lea.vmem %s294_s15, 1024  ;;  %s3386_s12 = smov [#allocation9]  }
  0x79   : > { %p3293_p13 = scmp.ne.s32.totalorder %s294_s15, %s3292_s10  ;;  %s3297_s23 = sshll.u32 %s3386_s12, 4  ;;  %s3298_s23 = int_to_ptr.vmem [resolvable:$false] %s3297_s23 }
  0x7a   : > { %s3299_s24 = scalar_lea.vmem %s3298_s23, 2048  ;;  %p3300_p10 = scmp.lt.s32.totalorder %s294_s15, %s3298_s23 }
  0x7b   : > { %p3295_p11 = pnand %p3293_p13, %p3522_p2  ;;  %p3301_p4 = scmp.lt.s32.totalorder %s3299_s24, %s3292_s10 }
  0x7d   : > { %p3296_p1 = pneg %p3295_p11  ;;  %p3302_p3 = por %p3301_p4, %p3300_p10 }
  0x7f   : > { %p3303_p7 = pnand %p3302_p3, %p3296_p1 }
  0x81   : > { %3306 = shalt.err (!%p3303_p7)
}
  0x82   : > { %p5159_p9 = scmp.ne.s32.totalorder %s5152_s13, 0  ;;  %p5160_p5 = scmp.ne.s32.totalorder %s5156_s14, 0 }
  0x84   : > { %2922 = dma.hbm_to_vmem [thread:$0]  (!%p5159_p9), %s3607_s29, 1024, %s294_s15, %s282_s30  }
  0x85   : > { %302 = sbr.rel (%p5160_p5) target bundleno = 653 (0x28d), region = 44 }
  0x8c   : > { %s3631_s28 = sand.u32 1, %s3373_s22   ;;  %p5161_p2 = scmp.ne.s32.totalorder %s5149_s7, 0 }
  0x8d   : > { %s3634_s26 = sshll.u32 %s3631_s28, 6  ;;  %s305_s16 = scalar_lea.sflag [#allocation4], %s3631_s28 }
  0x8e   : > { %s3638_s18 = scalar_lea.vmem [#allocation3], %s3634_s26 }
  0x8f   : > { %3352 = dma.done.wait (%p5161_p2), %s305_s16, 1024  }
  0x90   : > { %3354 = vsyncadd (%p5161_p2), %s305_s16, 4294966272  ;;  %s313_s13 = sand.u32 1, %s3459_s25   ;;  %s3646_s29 = scalar_lea.vmem [#allocation6], %s3634_s26 }
  0x91   : > { %s314_s14 = scalar_lea.sflag [#allocation7], %s313_s13 }
  0x92   : > { %3356 = dma.done.wait (%p5161_p2), %s314_s14, 2048  }
  0x93   : > { %3358 = vsyncadd (%p5161_p2), %s314_s14, 4294965248  ;;  %s3653_s15 = scalar_lea.vmem [#allocation8], %s3634_s26  ;;  %s332_s30 = scalar_lea.sflag [#allocation10], %s3631_s28 }
  0x94   : > { %s3657_s19 = scalar_lea.vmem [#allocation9], %s3634_s26 }
  0x95   : > { %3360 = dma.done.wait (%p5161_p2), %s332_s30, 1024  }
  0x96   : > { %3362 = vsyncadd (%p5161_p2), %s332_s30, 4294966272  ;;  %v5122_v0 = vmov 0.0|0.0   ;;  %v3668_v1 = vld [vmem:[%s3638_s18 + $0x38] sm:$0xff]  ;;  %v3671_v2 = vld [vmem:[%s3638_s18] sm:$0xff]  ;;  %s3388_s7 = smov 18   ;;  %s3389_s1 = smov 110   ;;  %v379_v50 = vlaneseq }
  0x97   : > { %2597 = vmatprep.subr.bf16.mxu0 %v5122_v0  ;;  %2671 = vmatprep.subr.bf16.mxu1 %v5122_v0  ;;  %v3674_v3 = vld [vmem:[%s3638_s18 + $0x8] sm:$0xff]  ;;  %v3681_v5 = vld [vmem:[%s3638_s18 + $0x10] sm:$0xff]  ;;  %v3684_v6 = vld [vmem:[%s3638_s18 + $0x18] sm:$0xff]  ;;  %s3390_s20 = smov 82   ;;  %s3391_s17 = smov 64   ;;  %vm5115_vm0 = vcmask 785408  }
  0x98   : > { %2598 = vmatpush1.bf16.msra.mxu0 %v5122_v0  ;;  %2672 = vmatpush1.bf16.msra.mxu1 %v5122_v0  ;;  %v2976_v4 = vpack.i.bf16 %v3674_v3, %v3671_v2  ;;  %v3688_v7 = vpack.i.bf16 %v3681_v5, %v3674_v3  ;;  %v2981_v8 = vpack.i.bf16 %v3684_v6, %v3681_v5  ;;  %v3694_v9 = vld [vmem:[%s3638_s18 + $0x20] sm:$0xff]  ;;  %v3699_v10 = vld [vmem:[%s3638_s18 + $0x30] sm:$0xff]  ;;  %v3705_v12 = vld [vmem:[%s3638_s18 + $0x28] sm:$0xff]  ;;  %s3392_s27 = smov 46   ;;  %s3393_s11 = smov 12   ;;  %v3845_v52 = vand.u32 127, %v379_v50 }
  0x99   : > { %677 = vrot.lane.b32.xlu1 %v3668_v1, %s3388_s7  ;;  %v2991_v11 = vpack.i.bf16 %v3694_v9, %v3684_v6  ;;  %v3001_v13 = vpack.i.bf16 %v3668_v1, %v3699_v10  ;;  %v2996_v14 = vpack.i.bf16 %v3705_v12, %v3671_v2  ;;  %v3716_v15 = vld [vmem:[%s3653_s15] sm:$0xff]  ;;  %v912_v18 = vld [vmem:[%s3646_s29 + $0x38] sm:$0xff]  ;;  %v3732_v19 = vld [vmem:[%s3646_s29 + $0x8] sm:$0xff]  ;;  %s3394_s10 = smov 116   ;;  %s3395_s12 = smov 70   ;;  %v3151_v47 = vpack.i.bf16 %v3705_v12, %v3694_v9 }
  0x9a   : > { %2977 = vrot.lane.b32.xlu0 %v2976_v4, %s3388_s7  ;;  %v3016_v16 = vpack.i.bf16 %v3716_v15, %v3694_v9  ;;  %v3727_v17 = vld [vmem:[%s3646_s29] sm:$0xff]  ;;  %v3735_v20 = vld [vmem:[%s3646_s29 + $0x10] sm:$0xff]  ;;  %v3744_v23 = vld [vmem:[%s3646_s29 + $0x28] sm:$0xff]  ;;  %s3396_s23 = smov 58   ;;  %s3397_s24 = smov 6   ;;  %v3156_v48 = vpack.i.bf16 %v3699_v10, %v3705_v12  ;;  %v3850_v53 = vadd.s32 128, %v3845_v52 }
  0x9b   : > { %v3031_v21 = vpack.i.bf16 %v912_v18, %v3727_v17  ;;  %v3041_v22 = vpack.i.bf16 %v3735_v20, %v3732_v19  ;;  %v3747_v24 = vld [vmem:[%s3646_s29 + $0x30] sm:$0xff]  ;;  %v3036_v25 = vpack.i.bf16 %v3732_v19, %v3727_v17  ;;  %v3752_v26 = vld [vmem:[%s3646_s29 + $0x18] sm:$0xff]  ;;  %v3755_v27 = vld [vmem:[%s3646_s29 + $0x20] sm:$0xff]  ;;  %s3398_s16 = smov 122   ;;  %v3857_v55 = vadd.s32 384, %v3845_v52  ;;  %p5299_p6 = scmp.ne.s32.totalorder %s5150_s8, 0 }
  0x9c   : > { %v3051_v28 = vpack.i.bf16 %v3747_v24, %v3744_v23  ;;  %v3046_v29 = vpack.i.bf16 %v3755_v27, %v3752_v26  ;;  %v3061_v30 = vpack.i.bf16 %v3744_v23, %v3755_v27  ;;  %v3764_v31 = vld [vmem:[%s3653_s15 + $0x8] sm:$0xff]  ;;  %v3056_v32 = vpack.i.bf16 %v3752_v26, %v3735_v20  ;;  %v3771_v34 = vld [vmem:[%s3653_s15 + $0x10] sm:$0xff]  ;;  %v3775_v36 = vld [vmem:[%s3653_s15 + $0x38] sm:$0xff] }
  0x9d   : > { %2987 = vrot.lane.b32.xlu1 %v3688_v7, %s3389_s1  ;;  %v3071_v33 = vpack.i.bf16 %v3764_v31, %v3716_v15  ;;  %v3066_v35 = vpack.i.bf16 %v912_v18, %v3747_v24  ;;  %v3081_v37 = vpack.i.bf16 %v3771_v34, %v3764_v31  ;;  %v3076_v38 = vpack.i.bf16 %v3775_v36, %v3771_v34  ;;  %v3783_v39 = vld [vmem:[%s3653_s15 + $0x18] sm:$0xff]  ;;  %v1295_v41 = vld [vmem:[%s3653_s15 + $0x20] sm:$0xff]  ;;  %v1296_v44 = vld [vmem:[%s3653_s15 + $0x28] sm:$0xff] }
  0x9e   : > { %2982 = vrot.lane.b32.xlu0 %v2981_v8, %s3388_s7  ;;  %v3086_v40 = vpack.i.bf16 %v3783_v39, %v3775_v36  ;;  %v3106_v42 = vpack.i.bf16 %v3783_v39, %v3771_v34  ;;  %v3116_v43 = vpack.i.bf16 %v1295_v41, %v3783_v39  ;;  %v3126_v45 = vpack.i.bf16 %v1296_v44, %v1295_v41  ;;  %v3813_v46 = vld [vmem:[%s5101_s4 + $0x8] sm:$0xff]  ;;  %v1297_v49 = vld [vmem:[%s3653_s15 + $0x30] sm:$0xff] }
  0x9f   : > { %2467 = vmatprep.mubr.msk.f32.mxu0 %vm5115_vm0, %v3813_v46  ;;  %2468 = vmatprep.mubr.msk.f32.mxu1 %vm5115_vm0, %v3813_v46  ;;  %v3166_v51 = vpack.i.bf16 %v1297_v49, %v1296_v44  ;;  %v3854_v54 = vand.u32 31, %v3850_v53  ;;  %v3860_v56 = vand.u32 31, %v3845_v52  ;;  %v382_v57 = vadd.s32 256, %v3845_v52 }
  0xa0   : > { %vm5113_vm1 = vcmp.lt.s32.totalorder %v3845_v52, 18  ;;  %v3870_v60 = vand.u32 31, %v3857_v55  ;;  %vm5112_vm4 = vcmp.lt.s32.totalorder %v3845_v52, 110  ;;  %vm3399_vm7 = vmmov 1  }
  0xa1   : > { %728 = vrot.lane.b32.xlu1 %v3671_v2, %s3389_s1  ;;  %vm486_vm2 = vcmp.ge.s32.totalorder %v3854_v54, 18  ;;  %vm485_vm3 = vcmp.ge.s32.totalorder %v3860_v56, 18  ;;  %v3873_v63 = vand.u32 31, %v382_v57  ;;  %vm616_vm5 = vcmp.lt.s32.totalorder %v3854_v54, 14 }
  0xa2   : > { %2992 = vrot.lane.b32.xlu0 %v2991_v11, %s3389_s1  ;;  %vm615_vm6 = vcmp.lt.s32.totalorder %v3860_v56, 14  ;;  %vm2600_vm8 = vmpackc.low %vm486_vm2, %vm3399_vm7  ;;  %vm488_vm10 = vcmp.ge.s32.totalorder %v3870_v60, 18  ;;  %vm1051_vm0 = vcmp.lt.s32.totalorder %v3860_v56, 20 }
  0xa3   : > { %vm2603_vm9 = vmpackc.low %vm485_vm3, %vm3399_vm7  ;;  %vm487_vm12 = vcmp.ge.s32.totalorder %v3873_v63, 18 }
  0xa4   : > { %vm2606_vm11 = vmpackc.low %vm616_vm5, %vm3399_vm7 }
  0xa5   : > { %3002 = vrot.lane.b32.xlu1 %v3001_v13, %s3390_s20  ;;  %vm3908_vm13 = vmpackc.low %vm615_vm6, %vm3399_vm7 }
  0xa6   : > { %2997 = vrot.lane.b32.xlu0 %v2996_v14, %s3390_s20  ;;  %vm2674_vm14 = vmpackc.low %vm488_vm10, %vm3399_vm7 }
  0xa7   : > { %vm2677_vm15 = vmpackc.low %vm487_vm12, %vm3399_vm7 }
  0xa9   : > { %3012 = vrot.lane.b32.xlu1 %v3001_v13, %s3391_s17 }
  0xaa   : > { %3007 = vrot.lane.b32.xlu0 %v2996_v14, %s3391_s17 }
  0xad   : > { %3017 = vrot.lane.b32.xlu1 %v3016_v16, %s3391_s17 }
  0xae   : > { %460 = vrot.lane.b32.xlu0 %v3694_v9, %s3390_s20 }
  0xb1   : > { %3027 = vrot.lane.b32.xlu1 %v3001_v13, %s3392_s27 }
  0xb2   : > { %3022 = vrot.lane.b32.xlu0 %v2996_v14, %s3392_s27 }
  0xb5   : > { %598 = vrot.lane.b32.xlu1 %v3694_v9, %s3392_s27 }
  0xb6   : > { %3032 = vrot.lane.b32.xlu0 %v3031_v21, %s3393_s11 }
  0xb9   : > { %3042 = vrot.lane.b32.xlu1 %v3041_v22, %s3393_s11 }
  0xba   : > { %3037 = vrot.lane.b32.xlu0 %v3036_v25, %s3394_s10 }
  0xbd   : > { %3052 = vrot.lane.b32.xlu1 %v3051_v28, %s3393_s11 }
  0xbe   : > { %3047 = vrot.lane.b32.xlu0 %v3046_v29, %s3393_s11  ;;  %s3402_s11 = smov [#allocation11]  }
  0xc1   : > { %3062 = vrot.lane.b32.xlu1 %v3061_v30, %s3394_s10 }
  0xc2   : > { %3057 = vrot.lane.b32.xlu0 %v3056_v32, %s3394_s10 }
  0xc5   : > { %3072 = vrot.lane.b32.xlu1 %v3071_v33, %s3395_s12 }
  0xc6   : > { %3067 = vrot.lane.b32.xlu0 %v3066_v35, %s3394_s10  ;;  %s3311_s10 = sshll.u32 %s3402_s11, 4  ;;  %s3312_s10 = int_to_ptr.vmem [resolvable:$false] %s3311_s10 }
  0xc9   : > { %3082 = vrot.lane.b32.xlu1 %v3081_v37, %s3391_s17 }
  0xca   : > { %3077 = vrot.lane.b32.xlu0 %v3076_v38, %s3395_s12 }
  0xcd   : > { %3092 = vrot.lane.b32.xlu1 %v3071_v33, %s3396_s23 }
  0xce   : > { %3087 = vrot.lane.b32.xlu0 %v3086_v40, %s3391_s17 }
  0xd1   : > { %3102 = vrot.lane.b32.xlu1 %v3071_v33, %s3397_s24 }
  0xd2   : > { %3097 = vrot.lane.b32.xlu0 %v3076_v38, %s3396_s23 }
  0xd5   : > { %1523 = vrot.lane.b32.xlu1 %v3775_v36, %s3397_s24 }
  0xd6   : > { %3107 = vrot.lane.b32.xlu0 %v3106_v42, %s3397_s24 }
  0xd9   : > { %3117 = vrot.lane.b32.xlu1 %v3116_v43, %s3398_s16 }
  0xda   : > { %3112 = vrot.lane.b32.xlu0 %v3081_v37, %s3398_s16 }
  0xdd   : > { %3122 = vrot.lane.b32.xlu1 %v3116_v43, %s3395_s12 }
  0xde   : > { %1574 = vrot.lane.b32.xlu0 %v3716_v15, %s3398_s16 }
  0xe1   : > { %3127 = vrot.lane.b32.xlu1 %v3126_v45, %s3391_s17 }
  0xe2   : > { %1309 = vrot.lane.b32.xlu0 %v1296_v44, %s3395_s12 }
  0xe5   : > { %1446 = vrot.lane.b32.xlu1 %v1296_v44, %s3396_s23 }
  0xe6   : > { %3132 = vrot.lane.b32.xlu0 %v3116_v43, %s3396_s23 }
  0xe9   : > { %458 = vrot.lane.b32.xlu1 %v3684_v6, %s3390_s20 }
  0xea   : > { %3137 = vrot.lane.b32.xlu0 %v3688_v7, %s3390_s20 }
  0xed   : > { %539 = vrot.lane.b32.xlu1 %v3684_v6, %s3391_s17 }
  0xee   : > { %3142 = vrot.lane.b32.xlu0 %v3688_v7, %s3391_s17 }
  0xf1   : > { %596 = vrot.lane.b32.xlu1 %v3684_v6, %s3392_s27 }
  0xf2   : > { %3147 = vrot.lane.b32.xlu0 %v3688_v7, %s3392_s27 }
  0xf5   : > { %675 = vrot.lane.b32.xlu1 %v3699_v10, %s3388_s7  ;;  %v5124_v10 = vmov 0.0  }
  0xf6   : > { %3152 = vrot.lane.b32.xlu0 %v3151_v47, %s3388_s7 }
  0xf9   : > { %742 = vrot.lane.b32.xlu1 %v3668_v1, %s3389_s1 }
  0xfa   : > { %3157 = vrot.lane.b32.xlu0 %v3156_v48, %s3389_s1 }
  0xfd   : > { %1392 = vrot.lane.b32.xlu1 %v1297_v49, %s3391_s17 }
  0xfe   : > { %1311 = vrot.lane.b32.xlu0 %v1297_v49, %s3395_s12  ;;  %s3313_s12 = scalar_lea.vmem %s3312_s10, 2048 }
 0x101   : > { %3162 = vrot.lane.b32.xlu1 %v3126_v45, %s3397_s24 }
 0x102   : > { %1448 = vrot.lane.b32.xlu0 %v1297_v49, %s3396_s23 }
 0x105   : > { %3167 = vrot.lane.b32.xlu1 %v3166_v51, %s3398_s16 }
 0x106   : > { %1521 = vrot.lane.b32.xlu0 %v1297_v49, %s3397_s24 }
 0x10a   : > { %1588 = vrot.lane.b32.xlu0 %v3775_v36, %s3398_s16 }
 0x10b   : > { %v3863_v58 = vpop.permute.xlu1 %677 }
 0x10c   : > { %v2978_v59 = vpop.permute.xlu0 %2977 }
 0x10d   : > { %v2980_v61 = vunpack.i.h.bf16 %v2978_v59  ;;  %v2979_v62 = vunpack.i.l.bf16 %v2978_v59 }
 0x10f   : > { %v2988_v1 = vpop.permute.xlu1 %2987  ;;  %v686_v4 = vsel %vm5113_vm1, %v2979_v62, %v2980_v61  ;;  %v687_v7 = vsel %vm5113_vm1, %v3863_v58, %v2979_v62 }
 0x110   : > { %v2990_v8 = vunpack.i.h.bf16 %v2988_v1  ;;  %v2989_v9 = vunpack.i.l.bf16 %v2988_v1  ;;  %v2599_v11 = vpack.c.bf16 %v686_v4, %v5124_v10  ;;  %v2602_v12 = vpack.c.bf16 %v687_v7, %v5124_v10  ;;  %v3888_v13 = vpop.permute.xlu0 %2982 }
 0x111   : > { %v5119_v16 = vunpack.i.h.bf16 %v3888_v13  ;;  %v2984_v18 = vunpack.i.l.bf16 %v3888_v13 }
 0x112   : > { %v750_v14 = vsel %vm5112_vm4, %v2989_v9, %v2990_v8  ;;  %2601 = vmatprep.subr.msk.bf16.mxu0 %vm2600_vm8, %v2599_v11  ;;  %vm618_vm8 = vcmp.lt.s32.totalorder %v3870_v60, 14 }
 0x113   : > { %v2605_v21 = vpack.c.bf16 %v750_v14, %v3674_v3  ;;  %v3903_v22 = vpop.permute.xlu1 %728  ;;  %v684_v28 = vsel %vm5113_vm1, %v2984_v18, %v5119_v16  ;;  %v685_v29 = vsel %vm5113_vm1, %v2980_v61, %v2984_v18  ;;  %2604 = vmatpush1.bf16.msk.msra.mxu0 %vm2603_vm9, %v2602_v12  ;;  %vm617_vm9 = vcmp.lt.s32.totalorder %v3873_v63, 14 }
 0x114   : > { %v751_v3 = vsel %vm5112_vm4, %v3903_v22, %v2989_v9  ;;  %v2673_v30 = vpack.c.bf16 %v684_v28, %v5124_v10  ;;  %v2676_v32 = vpack.c.bf16 %v685_v29, %v5124_v10  ;;  %v3927_v35 = vpop.permute.xlu0 %2992 }
 0x115   : > { %v2608_v33 = vpack.c.bf16 %v751_v3, %v3671_v2  ;;  %2607 = vmatprep.subr.msk.bf16.mxu0 %vm2606_vm11, %v2605_v21  ;;  %v5118_v36 = vunpack.i.h.bf16 %v3927_v35  ;;  %v2994_v37 = vunpack.i.l.bf16 %v3927_v35  ;;  %vm2680_vm11 = vmpackc.low %vm618_vm8, %vm3399_vm7 }
 0x116   : > { %2675 = vmatprep.subr.msk.bf16.mxu1 %vm2674_vm14, %v2673_v30  ;;  %vm2683_vm14 = vmpackc.low %vm617_vm9, %vm3399_vm7  ;;  %v1993_v30 = vld [vmem:[%s5102_s5] sm:$0xff] }
 0x117   : > { %v3003_v38 = vpop.permute.xlu1 %3002  ;;  %v748_v2 = vsel %vm5112_vm4, %v2994_v37, %v5118_v36  ;;  %v749_v40 = vsel %vm5112_vm4, %v2990_v8, %v2994_v37  ;;  %2678 = vmatpush1.bf16.msk.msra.mxu1 %vm2677_vm15, %v2676_v32  ;;  %2610 = vmatpush1.bf16.msk.msra.mxu0 %vm3908_vm13, %v2608_v33  ;;  %vm788_vm4 = vcmp.lt.s32.totalorder %v3857_v55, 448  ;;  %vm5116_vm15 = vcmp.lt.s32.totalorder %v3845_v52, 82 }
 0x118   : > { %v2679_v41 = vpack.c.bf16 %v748_v2, %v3684_v6  ;;  %v2682_v42 = vpack.c.bf16 %v749_v40, %v3681_v5  ;;  %v3949_v43 = vpop.permute.xlu0 %2997  ;;  %v3004_v44 = vunpack.i.l.bf16 %v3003_v38  ;;  %vm5117_vm13 = vcmp.lt.s32.totalorder %v3845_v52, 64  ;;  %vm796_vm1 = vmand %vm788_vm4, %vm488_vm10 }
 0x119   : > { %v3000_v45 = vunpack.i.h.bf16 %v3949_v43  ;;  %v3005_v6 = vunpack.i.h.bf16 %v3003_v38  ;;  %v5131_v5 = vunpack.i.l.bf16 %v3949_v43  ;;  %vm2689_vm10 = vmpackc.low %vm3399_vm7, %vm487_vm12  ;;  %v3401_v33 = vmov 0  }
 0x11a   : > { %2681 = vmatprep.subr.msk.bf16.mxu1 %vm2680_vm11, %v2679_v41  ;;  %vm3978_vm11 = vmpackc.low %vm3399_vm7, %vm486_vm2  ;;  %3171 = vset.pattern.permute.xlu1 %v3401_v33 }
 0x11b   : > { %v3013_v47 = vpop.permute.xlu1 %3012  ;;  %2684 = vmatpush1.bf16.msk.msra.mxu1 %vm2683_vm14, %v2682_v42  ;;  %v469_v59 = vsel %vm5116_vm15, %v3004_v44, %v3005_v6  ;;  %v470_v61 = vsel %vm5116_vm15, %v3000_v45, %v3004_v44  ;;  %v476_v7 = vsel %vm5116_vm15, %v3005_v6, %v5131_v5  ;;  %vm2686_vm2 = vmpackc.low %vm788_vm4, %vm796_vm1  ;;  %vm5114_vm1 = vcmp.lt.s32.totalorder %v3845_v52, 46  ;;  %1996 = vperm.xlu1 %3171, %v1993_v30  }
 0x11c   : > { %v3015_v48 = vunpack.i.h.bf16 %v3013_v47  ;;  %v3014_v49 = vunpack.i.l.bf16 %v3013_v47  ;;  %v3959_v50 = vpop.permute.xlu0 %3007  ;;  %vm2615_vm14 = vmpackc.low %vm3399_vm7, %vm485_vm3  ;;  %3172 = vset.pattern.permute.xlu0 %v3401_v33 }
 0x11d   : > { %v3010_v51 = vunpack.i.h.bf16 %v3959_v50  ;;  %v5129_v57 = vunpack.i.l.bf16 %v3959_v50  ;;  %vm4020_vm3 = vmpackc.low %vm3399_vm7, %vm616_vm5  ;;  %vm929_vm5 = vcmp.lt.s32.totalorder %v3845_v52, 12 }
 0x11e   : > { %v550_v62 = vsel %vm5117_vm13, %v3014_v49, %v3015_v48  ;;  %vm4032_vm12 = vmpackc.low %vm3399_vm7, %vm615_vm6  ;;  %vm1042_vm6 = vcmp.lt.s32.totalorder %v3845_v52, 116 }
 0x11f   : > { %v3973_v1 = vpop.permute.xlu1 %3017  ;;  %v551_v8 = vsel %vm5117_vm13, %v3010_v51, %v3014_v49  ;;  %v557_v9 = vsel %vm5117_vm13, %v3015_v48, %v5129_v57  ;;  %v2688_v21 = vpack.c.bf16 %v550_v62, %v469_v59 }
 0x120   : > { %v3019_v11 = vunpack.i.l.bf16 %v3973_v1  ;;  %v2611_v12 = vpack.c.bf16 %v551_v8, %v470_v61  ;;  %v3995_v14 = vpack.c.bf16 %v557_v9, %v476_v7  ;;  %v461_v18 = vpop.permute.xlu0 %460 }
 0x121   : > { %v471_v25 = vsel %vm5116_vm15, %v461_v18, %v3000_v45  ;;  %vm1053_vm15 = vcmp.lt.s32.totalorder %v3873_v63, 20 }
 0x122   : > { %v552_v28 = vsel %vm5117_vm13, %v3019_v11, %v3010_v51  ;;  %2613 = vmatprep.subr.msk.bf16.mxu0 %vm3978_vm11, %v2611_v12  ;;  %2687 = vmatprep.subr.msk.bf16.mxu1 %vm2686_vm2, %v3995_v14  ;;  %vm868_vm11 = vmand %vm788_vm4, %vm618_vm8  ;;  %vm949_vm2 = vcmp.ge.s32.totalorder %v3870_v60, 12 }
 0x123   : > { %v2614_v29 = vpack.c.bf16 %v552_v28, %v471_v25  ;;  %v3028_v3 = vpop.permute.xlu1 %3027  ;;  %2690 = vmatpush1.bf16.msk.msra.mxu1 %vm2689_vm10, %v2688_v21  ;;  %vm947_vm10 = vcmp.ge.s32.totalorder %v3854_v54, 12  ;;  %vm4062_vm4 = vmpackc.low %vm949_vm2, %vm868_vm11 }
 0x124   : > { %v3029_v32 = vunpack.i.l.bf16 %v3028_v3  ;;  %v4014_v37 = vpop.permute.xlu0 %3022  ;;  %v3030_v41 = vunpack.i.h.bf16 %v3028_v3  ;;  %vm4074_vm8 = vmpackc.low %vm3399_vm7, %vm617_vm9 }
 0x125   : > { %2616 = vmatpush1.bf16.msk.msra.mxu0 %vm2615_vm14, %v2614_v29  ;;  %v3025_v38 = vunpack.i.h.bf16 %v4014_v37  ;;  %v5127_v44 = vunpack.i.l.bf16 %v4014_v37  ;;  %vm1054_vm14 = vcmp.lt.s32.totalorder %v3870_v60, 20  ;;  %vm2626_vm9 = vmpackc.low %vm3399_vm7, %vm947_vm10 }
 0x126   : > { %v607_v51 = vsel %vm5114_vm1, %v3029_v32, %v3030_v41  ;;  %vm4172_vm13 = vmpackc.low %vm949_vm2, %vm1054_vm14 }
 0x127   : > { %v599_v2 = vpop.permute.xlu1 %598  ;;  %v608_v42 = vsel %vm5114_vm1, %v3025_v38, %v3029_v32  ;;  %v4054_v55 = vsel %vm5114_vm1, %v3030_v41, %v5127_v44  ;;  %v2694_v11 = vpack.c.bf16 %v5124_v10, %v607_v51 }
 0x128   : > { %v609_v45 = vsel %vm5114_vm1, %v599_v2, %v3025_v38  ;;  %v2617_v6 = vpack.c.bf16 %v5124_v10, %v608_v42  ;;  %v3033_v49 = vpop.permute.xlu0 %3032  ;;  %vm2702_vm1 = vmpackc.low %vm3399_vm7, %vm949_vm2 }
 0x129   : > { %v2620_v48 = vpack.c.bf16 %v5124_v10, %v609_v45  ;;  %v3035_v59 = vunpack.i.h.bf16 %v3033_v49  ;;  %v3034_v61 = vunpack.i.l.bf16 %v3033_v49 }
 0x12a   : > { %2619 = vmatprep.subr.msk.bf16.mxu0 %vm4020_vm3, %v2617_v6  ;;  %vm946_vm3 = vcmp.ge.s32.totalorder %v3860_v56, 12 }
 0x12b   : > { %v3043_v62 = vpop.permute.xlu1 %3042  ;;  %v937_v4 = vsel %vm929_vm5, %v3035_v59, %v3034_v61  ;;  %2622 = vmatpush1.bf16.msk.msra.mxu0 %vm4032_vm12, %v2620_v48  ;;  %vm4110_vm12 = vmpackc.low %vm1054_vm14, %vm3399_vm7  ;;  %vm1325_vm14 = vcmp.ge.s32.totalorder %v3850_v53, 192 }
 0x12c   : > { %v3045_v7 = vunpack.i.h.bf16 %v3043_v62  ;;  %v3044_v8 = vunpack.i.l.bf16 %v3043_v62  ;;  %v2691_v12 = vpack.c.bf16 %v937_v4, %v4054_v55  ;;  %v4068_v18 = vpop.permute.xlu0 %3037  ;;  %2623 = vmatprep.subr.bf16.mxu0 %v5122_v0  ;;  %vm2629_vm11 = vmpackc.low %vm3399_vm7, %vm946_vm3  ;;  %v2628_v45 = vpack.c.bf16 %v3727_v17, %v937_v4 }
 0x12d   : > { %v3040_v29 = vunpack.i.h.bf16 %v4068_v18  ;;  %v3039_v3 = vunpack.i.l.bf16 %v4068_v18 }
 0x12e   : > { %v935_v25 = vsel %vm929_vm5, %v3044_v8, %v3045_v7  ;;  %v936_v28 = vsel %vm929_vm5, %v3034_v61, %v3044_v8  ;;  %2693 = vmatprep.subr.msk.bf16.mxu1 %vm4062_vm4, %v2691_v12  ;;  %vm948_vm4 = vcmp.ge.s32.totalorder %v3873_v63, 12 }
 0x12f   : > { %v2625_v30 = vpack.c.bf16 %v3732_v19, %v936_v28  ;;  %v4091_v32 = vpack.c.bf16 %v935_v25, %v5124_v10  ;;  %v4094_v33 = vpack.c.bf16 %v936_v28, %v5124_v10  ;;  %v3053_v38 = vpop.permute.xlu1 %3052  ;;  %v4102_v2 = vsel %vm1042_vm6, %v3039_v3, %v3040_v29  ;;  %2624 = vmatpush1.bf16.msra.mxu0 %v5122_v0  ;;  %vm4222_vm2 = vmpackc.low %vm948_vm4, %vm1053_vm15 }
 0x130   : > { %v3055_v40 = vunpack.i.h.bf16 %v3053_v38  ;;  %2696 = vmatpush1.bf16.msk.msra.mxu1 %vm4074_vm8, %v2694_v11  ;;  %v2697_v41 = vpack.c.bf16 %v4102_v2, %v3727_v17  ;;  %v3048_v42 = vpop.permute.xlu0 %3047  ;;  %vm5143_vm8 = vcmp.lt.s32.totalorder %v3845_v52, 70  ;;  %v3054_v17 = vunpack.i.l.bf16 %v3053_v38 }
 0x131   : > { %2627 = vmatprep.subr.msk.bf16.mxu0 %vm2626_vm9, %v2625_v30  ;;  %v3049_v6 = vunpack.i.l.bf16 %v3048_v42  ;;  %vm1052_vm9 = vcmp.lt.s32.totalorder %v3854_v54, 20  ;;  %v2704_v12 = vpack.c.bf16 %v3735_v20, %v935_v25  ;;  %v3020_v38 = vunpack.i.h.bf16 %v3973_v1 }
 0x132   : > { %v4122_v47 = vsel %vm929_vm5, %v3055_v40, %v3035_v59  ;;  %2699 = vmatprep.subr.msk.bf16.mxu1 %vm4110_vm12, %v2697_v41  ;;  %v3050_v59 = vunpack.i.h.bf16 %v3048_v42  ;;  %v4158_v30 = vsel %vm929_vm5, %v3054_v17, %v3055_v40  ;;  %v4504_v19 = vadd.s32 768, %v3845_v52 }
 0x133   : > { %v3063_v48 = vpop.permute.xlu1 %3062  ;;  %v934_v49 = vsel %vm929_vm5, %v3045_v7, %v3049_v6  ;;  %2630 = vmatpush1.bf16.msk.msra.mxu0 %vm2629_vm11, %v2628_v45  ;;  %vm4142_vm11 = vmpackc.low %vm3399_vm7, %vm948_vm4  ;;  %vm5186_vm4 = vcmp.lt.s32.totalorder %v3845_v52, 64 }
 0x134   : > { %v3065_v51 = vunpack.i.h.bf16 %v3063_v48  ;;  %2700 = vmatpush1.bf16.msra.mxu1 %v5122_v0  ;;  %v4133_v61 = vpack.c.bf16 %v934_v49, %v5124_v10  ;;  %v3064_v62 = vunpack.i.l.bf16 %v3063_v48  ;;  %v3058_v4 = vpop.permute.xlu0 %3057  ;;  %v2701_v9 = vpack.c.bf16 %v3752_v26, %v934_v49 }
 0x135   : > { %v3060_v7 = vunpack.i.h.bf16 %v3058_v4  ;;  %v3059_v8 = vunpack.i.l.bf16 %v3058_v4  ;;  %v4178_v40 = vsel %vm929_vm5, %v3050_v59, %v3054_v17  ;;  %v4182_v42 = vsel %vm929_vm5, %v3049_v6, %v3050_v59  ;;  %vm4208_vm5 = vmpackc.low %vm946_vm3, %vm1051_vm0 }
 0x136   : > { %v4150_v21 = vsel %vm1042_vm6, %v3064_v62, %v3065_v51  ;;  %2703 = vmatprep.subr.msk.bf16.mxu1 %vm2702_vm1, %v2701_v9  ;;  %vm2632_vm1 = vmpackc.low %vm947_vm10, %vm1052_vm9  ;;  %v2634_v59 = vpack.c.bf16 %v934_v49, %v4102_v2  ;;  %vm1333_vm3 = vcmp.ge.s32.totalorder %v3854_v54, 6 }
 0x137   : > { %v4152_v28 = vpop.permute.xlu1 %3072  ;;  %v1046_v20 = vsel %vm1042_vm6, %v3060_v7, %v3064_v62  ;;  %v4166_v25 = vsel %vm1042_vm6, %v3059_v8, %v3060_v7  ;;  %v4187_v48 = vsel %vm1042_vm6, %v3040_v29, %v3059_v8  ;;  %v4197_v17 = vpack.c.bf16 %v4150_v21, %v3755_v27  ;;  %vm4231_vm10 = vmpackc.low %vm1052_vm9, %vm3399_vm7 }
 0x138   : > { %v2707_v45 = vpack.c.bf16 %v4158_v30, %v1046_v20  ;;  %2706 = vmatpush1.bf16.msk.msra.mxu1 %vm4142_vm11, %v2704_v12  ;;  %v3068_v62 = vpop.permute.xlu0 %3067  ;;  %v2631_v6 = vpack.c.bf16 %v4182_v42, %v4187_v48  ;;  %v2710_v29 = vpack.c.bf16 %v4178_v40, %v4166_v25  ;;  %v3075_v7 = vunpack.i.h.bf16 %v4152_v28  ;;  %vm5187_vm9 = vmmov %vm5186_vm4 }
 0x139   : > { %v3074_v27 = vunpack.i.l.bf16 %v4152_v28  ;;  %v3070_v8 = vunpack.i.h.bf16 %v3068_v62  ;;  %v3069_v9 = vunpack.i.l.bf16 %v3068_v62  ;;  %v4264_v18 = vpack.c.bf16 %v1046_v20, %v3752_v26 }
 0x13a   : > { %2709 = vmatprep.subr.msk.bf16.mxu1 %vm4172_vm13, %v2707_v45  ;;  %2633 = vmatprep.subr.msk.bf16.mxu0 %vm2632_vm1, %v2631_v6  ;;  %vm1334_vm13 = vcmp.ge.s32.totalorder %v3873_v63, 6  ;;  %vm1462_vm1 = vcmp.lt.s32.totalorder %v3854_v54, 26 }
 0x13b   : > { %v4214_v11 = vpop.permute.xlu1 %3082  ;;  %v1043_v41 = vsel %vm1042_vm6, %v3069_v9, %v3070_v8  ;;  %v1044_v45 = vsel %vm1042_vm6, %v3065_v51, %v3069_v9  ;;  %v4245_v62 = vsel %vm1042_vm6, %v3070_v8, %v3039_v3  ;;  %2636 = vmatpush1.bf16.msk.msra.mxu0 %vm4208_vm5, %v2634_v59  ;;  %vm2641_vm6 = vmpackc.low %vm1051_vm0, %vm3399_vm7  ;;  %v1322_v1 = vsel %vm5143_vm8, %v3074_v27, %v3075_v7 }
 0x13c   : > { %v3085_v49 = vunpack.i.h.bf16 %v4214_v11  ;;  %v3084_v12 = vunpack.i.l.bf16 %v4214_v11  ;;  %v4249_v6 = vpop.permute.xlu0 %3077  ;;  %v2713_v36 = vpack.c.bf16 %v1043_v41, %v3747_v24  ;;  %v2716_v16 = vpack.c.bf16 %v1044_v45, %v3744_v23  ;;  %2712 = vmatpush1.bf16.msk.msra.mxu1 %vm4222_vm2, %v2710_v29  ;;  %2639 = vmatprep.subr.msk.bf16.mxu0 %vm4231_vm10, %v4197_v17  ;;  %vm2717_vm0 = vmpackc.low %vm1053_vm15, %vm3399_vm7 }
 0x13d   : > { %v4256_v51 = vpack.c.bf16 %v5124_v10, %v1044_v45  ;;  %v4270_v24 = vpack.c.bf16 %v5124_v10, %v4245_v62  ;;  %v4273_v23 = vpack.c.bf16 %v5124_v10, %v1043_v41  ;;  %v5120_v29 = vunpack.i.h.bf16 %v4249_v6  ;;  %vm4298_vm15 = vmand %vm1325_vm14, %vm1333_vm3 }
 0x13e   : > { %v1401_v26 = vsel %vm5186_vm4, %v3084_v12, %v3085_v49  ;;  %v1402_v20 = vsel %vm5187_vm9, %v3020_v38, %v3084_v12  ;;  %v3079_v59 = vunpack.i.l.bf16 %v4249_v6  ;;  %2715 = vmatprep.subr.msk.bf16.mxu1 %vm4110_vm12, %v2713_v36  ;;  %vm5190_vm12 = vcmp.ge.s32.totalorder %v3870_v60, 6  ;;  %vm4321_vm2 = vmpackc.low %vm3399_vm7, %vm1334_vm13 }
 0x13f   : > { %v3093_v3 = vpop.permute.xlu1 %3092  ;;  %2642 = vmatpush1.bf16.msk.msra.mxu0 %vm2641_vm6, %v4264_v18  ;;  %vm4310_vm11 = vmpackc.low %vm3399_vm7, %vm5190_vm12  ;;  %v2722_v2 = vpack.c.bf16 %v1402_v20, %v1322_v1  ;;  %vm5134_vm5 = vcmp.lt.s32.totalorder %v3845_v52, 6  ;;  %vm5128_vm9 = vcmp.lt.s32.totalorder %v3845_v52, 58  ;;  %vm1464_vm12 = vcmp.lt.s32.totalorder %v3870_v60, 26 }
 0x140   : > { %v4292_v4 = vpop.permute.xlu0 %3087  ;;  %v1321_v9 = vsel %vm5143_vm8, %v3075_v7, %v3079_v59  ;;  %2718 = vmatpush1.bf16.msk.msra.mxu1 %vm2717_vm0, %v2716_v16  ;;  %v1323_v7 = vsel %vm5143_vm8, %v5120_v29, %v3074_v27  ;;  %vm5195_vm10 = vmmov %vm5186_vm4  ;;  %vm1332_vm4 = vcmp.ge.s32.totalorder %v3860_v56, 6 }
 0x141   : > { %v5126_v36 = vunpack.i.l.bf16 %v4292_v4  ;;  %v4315_v12 = vpack.c.bf16 %v1401_v26, %v1321_v9  ;;  %vm2644_vm6 = vmpackc.low %vm1325_vm14, %vm4298_vm15  ;;  %v3095_v9 = vunpack.i.h.bf16 %v3093_v3 }
 0x142   : > { %vm1470_vm0 = vmand %vm1325_vm14, %vm1462_vm1 }
 0x143   : > { %v3103_v28 = vpop.permute.xlu1 %3102  ;;  %v1403_v41 = vsel %vm5195_vm10, %v5126_v36, %v3020_v38  ;;  %2721 = vmatprep.subr.msk.bf16.mxu1 %vm4310_vm11, %v4315_v12  ;;  %v3094_v38 = vunpack.i.l.bf16 %v3093_v3  ;;  %vm2648_vm14 = vmpackc.low %vm1333_vm3, %vm1470_vm0  ;;  %vm1463_vm10 = vcmp.lt.s32.totalorder %v3873_v63, 26  ;;  %vm5198_vm0 = vcmp.ge.s32.totalorder %v3870_v60, 6  ;;  %v4565_v63 = vld [vmem:[%s5101_s4] sm:$0xff] }
 0x144   : > { %v3105_v45 = vunpack.i.h.bf16 %v3103_v28  ;;  %v3104_v1 = vunpack.i.l.bf16 %v3103_v28  ;;  %v4337_v26 = vpack.c.bf16 %v1403_v41, %v1323_v7  ;;  %v4342_v20 = vpop.permute.xlu0 %3097  ;;  %2724 = vmatpush1.bf16.msk.msra.mxu1 %vm4321_vm2, %v2722_v2  ;;  %vm2651_vm15 = vmpackc.low %vm1332_vm4, %vm3399_vm7 }
 0x145   : > { %v5121_v8 = vunpack.i.h.bf16 %v4342_v20  ;;  %v5132_v28 = vunpack.i.l.bf16 %v4342_v20 }
 0x146   : > { %5196 = vst [vmem:[#allocation20_spill] sm:$0xff] %v4337_v26  ;;  %v1532_v27 = vsel %vm5134_vm5, %v3104_v1, %v3105_v45  ;;  %2645 = vmatprep.subr.msk.bf16.mxu0 %vm2644_vm6, %v4337_v26  ;;  %vm5142_vm6 = vcmp.lt.s32.totalorder %v3845_v52, 122 }
 0x147   : > { %v4356_v7 = vpop.permute.xlu1 %1523  ;;  %v4363_v53 = vsel %vm5128_vm9, %v5121_v8, %v3094_v38  ;;  %2646 = vmatpush1.bf16.msra.mxu0 %v5122_v0  ;;  %v1459_v0 = vsel %vm5128_vm9, %v3094_v38, %v3095_v9 }
 0x148   : > { %5197 = vst [vmem:[#allocation21_spill] sm:$0xff] %v4363_v53  ;;  %v1533_v2 = vsel %vm5134_vm5, %v4356_v7, %v3104_v1  ;;  %v2647_v3 = vpack.c.bf16 %v1532_v27, %v4363_v53  ;;  %v4373_v29 = vpop.permute.xlu0 %3107  ;;  %v4388_v27 = vsel %vm5128_vm9, %v3095_v9, %v5132_v28  ;;  %vm2726_vm9 = vmpackc.low %vm5198_vm0, %vm1464_vm12  ;;  %vm1461_vm0 = vcmp.lt.s32.totalorder %v3860_v56, 26 }
 0x149   : > { %v2650_v41 = vpack.c.bf16 %v1533_v2, %v5124_v10  ;;  %v5130_v8 = vunpack.i.h.bf16 %v4373_v29  ;;  %v3109_v1 = vunpack.i.l.bf16 %v4373_v29 }
 0x14a   : > { %2649 = vmatprep.subr.msk.bf16.mxu0 %vm2648_vm14, %v2647_v3  ;;  %vm2729_vm14 = vmpackc.low %vm1334_vm13, %vm1463_vm10 }
 0x14b   : > { %v4391_v2 = vpop.permute.xlu1 %3117  ;;  %v1530_v10 = vsel %vm5134_vm5, %v3109_v1, %v5130_v8  ;;  %v1531_v36 = vsel %vm5134_vm5, %v3105_v45, %v3109_v1  ;;  %2652 = vmatpush1.bf16.msk.msra.mxu0 %vm2651_vm15, %v2650_v41  ;;  %v3090_v45 = vunpack.i.h.bf16 %v4292_v4  ;;  %vm2732_vm15 = vmpackc.low %vm1464_vm12, %vm3399_vm7  ;;  %vm5200_vm5 = vcmp.lt.s32.totalorder %v3845_v52, 64 }
 0x14c   : > { %v5133_v38 = vunpack.i.h.bf16 %v4391_v2  ;;  %v3119_v44 = vunpack.i.l.bf16 %v4391_v2  ;;  %v2725_v9 = vpack.c.bf16 %v1530_v10, %v4388_v27  ;;  %v2728_v3 = vpack.c.bf16 %v1531_v36, %v1459_v0  ;;  %v3113_v57 = vpop.permute.xlu0 %3112  ;;  %vm2654_vm13 = vmpackc.low %vm1462_vm1, %vm3399_vm7 }
 0x14d   : > { %v3115_v1 = vunpack.i.h.bf16 %v3113_v57  ;;  %v3114_v8 = vunpack.i.l.bf16 %v3113_v57 }
 0x14e   : > { %v1594_v41 = vsel %vm5142_vm6, %v3119_v44, %v5133_v38  ;;  %2727 = vmatprep.subr.msk.bf16.mxu1 %vm2726_vm9, %v2725_v9  ;;  %vm2735_vm9 = vmpackc.low %vm1463_vm10, %vm3399_vm7 }
 0x14f   : > { %v2731_v0 = vpack.c.bf16 %v1594_v41, %v3783_v39  ;;  %v3123_v10 = vpop.permute.xlu1 %3122  ;;  %v1595_v36 = vsel %vm5142_vm6, %v3115_v1, %v3119_v44  ;;  %v1596_v5 = vsel %vm5142_vm6, %v3114_v8, %v3115_v1  ;;  %2730 = vmatpush1.bf16.msk.msra.mxu1 %vm2729_vm14, %v2728_v3  ;;  %v1400_v44 = vsel %vm5200_vm5, %v3085_v49, %v3090_v45  ;;  %vm2657_vm14 = vmpackc.low %vm1461_vm0, %vm3399_vm7 }
 0x150   : > { %v3125_v28 = vunpack.i.h.bf16 %v3123_v10  ;;  %v3124_v38 = vunpack.i.l.bf16 %v3123_v10  ;;  %v2734_v57 = vpack.c.bf16 %v1595_v36, %v3771_v34  ;;  %v2653_v39 = vpack.c.bf16 %v1596_v5, %v3764_v31  ;;  %v4429_v9 = vpop.permute.xlu0 %1574  ;;  %vm2660_vm5 = vmpackc.low %vm3399_vm7, %vm1333_vm3 }
 0x151   : > { %5199 = vst [vmem:[#allocation22_spill] sm:$0xff] %v4429_v9  ;;  %2733 = vmatprep.subr.msk.bf16.mxu1 %vm2732_vm15, %v2731_v0  ;;  %v1597_v31 = vsel %vm5142_vm6, %v4429_v9, %v3114_v8  ;;  %vm5202_vm15 = vcmp.lt.s32.totalorder %v3845_v52, 64  ;;  %v4482_v36 = vadd.s32 512, %v3845_v52 }
 0x152   : > { %v1320_v3 = vsel %vm5143_vm8, %v3079_v59, %v3124_v38  ;;  %v2656_v5 = vpack.c.bf16 %v1597_v31, %v3716_v15  ;;  %2655 = vmatprep.subr.msk.bf16.mxu0 %vm2654_vm13, %v2653_v39  ;;  %v1319_v49 = vsel %vm5143_vm8, %v3124_v38, %v3125_v28  ;;  %vm5203_vm3 = vmmov %vm5202_vm15  ;;  %v1752_v39 = vld [vmem:[%s3657_s19 + $0x8] sm:$0xff]  ;;  %v1754_v31 = vld [vmem:[%s3657_s19 + $0x18] sm:$0xff] }
 0x153   : > { %v4448_v34 = vpack.c.bf16 %v1400_v44, %v1320_v3  ;;  %v4451_v11 = vpop.permute.xlu1 %3127  ;;  %2736 = vmatpush1.bf16.msk.msra.mxu1 %vm2735_vm9, %v2734_v57  ;;  %vm2663_vm13 = vmpackc.low %vm3399_vm7, %vm1332_vm4  ;;  %v385_v57 = vadd.s32 640, %v3845_v52  ;;  %v387_v44 = vadd.s32 896, %v3845_v52  ;;  %v1753_v3 = vld [vmem:[%s3657_s19 + $0x10] sm:$0xff]  ;;  %v4515_v16 = vand.u32 31, %v4482_v36 }
 0x154   : > { %v5135_v59 = vunpack.i.h.bf16 %v4451_v11  ;;  %v3129_v8 = vunpack.i.l.bf16 %v4451_v11  ;;  %v4460_v41 = vpop.permute.xlu0 %1309  ;;  %2658 = vmatpush1.bf16.msk.msra.mxu0 %vm2657_vm14, %v2656_v5  ;;  %vm4499_vm4 = vmpackc.low %vm3399_vm7, %vm1462_vm1  ;;  %vm5210_vm1 = vcmp.lt.s32.totalorder %v3845_v52, 58 }
 0x155   : > { %5201 = vst [vmem:[#allocation23_spill] sm:$0xff] %v4448_v34  ;;  %v1318_v38 = vsel %vm5143_vm8, %v3125_v28, %v4460_v41  ;;  %2661 = vmatprep.subr.msk.bf16.mxu0 %vm2660_vm5, %v4448_v34  ;;  %vm5213_vm9 = vmmov %vm5210_vm1  ;;  %v4539_v53 = vand.u32 31, %v385_v57 }
 0x156   : > { %v1399_v15 = vsel %vm5202_vm15, %v3090_v45, %v3129_v8  ;;  %v1398_v1 = vsel %vm5203_vm3, %v3129_v8, %v5135_v59  ;;  %vm2747_vm14 = vmpackc.low %vm3399_vm7, %vm1463_vm10  ;;  %vm489_vm10 = vcmp.ge.s32.totalorder %v4515_v16, 18 }
 0x157   : > { %v4475_v0 = vpack.c.bf16 %v1399_v15, %v1319_v49  ;;  %v4477_v10 = vpack.c.bf16 %v1398_v1, %v1318_v38  ;;  %v4479_v45 = vpop.permute.xlu1 %1446  ;;  %vm490_vm5 = vcmp.ge.s32.totalorder %v4539_v53, 18  ;;  %vm620_vm8 = vcmp.lt.s32.totalorder %v4539_v53, 14 }
 0x158   : > { %v3133_v28 = vpop.permute.xlu0 %3132  ;;  %2664 = vmatpush1.bf16.msk.msra.mxu0 %vm2663_vm13, %v4315_v12  ;;  %v1751_v12 = vld [vmem:[%s3657_s19] sm:$0xff]  ;;  %vm5218_vm13 = vcmp.lt.s32.totalorder %v3845_v52, 82 }
 0x159   : > { %5204 = vst [vmem:[#allocation24_spill] sm:$0xff] %v4475_v0  ;;  %5205 = vst [vmem:[#allocation25_spill] sm:$0xff] %v4477_v10  ;;  %2739 = vmatprep.subr.msk.bf16.mxu1 %vm4310_vm11, %v4477_v10  ;;  %v3135_v5 = vunpack.i.h.bf16 %v3133_v28  ;;  %v3134_v49 = vunpack.i.l.bf16 %v3133_v28  ;;  %v5212_v28 = vunpack.i.l.bf16 %v4342_v20  ;;  %v2668_v56 = vpack.c.bf16 %v1751_v12, %v4388_v27 }
 0x15a   : > { %2742 = vmatpush1.bf16.msk.msra.mxu1 %vm4321_vm2, %v4475_v0  ;;  %vm4510_vm11 = vmpackc.low %vm3399_vm7, %vm1464_vm12  ;;  %v5226_v12 = vunpack.i.l.bf16 %v3959_v50 }
 0x15b   : > { %v459_v15 = vpop.permute.xlu1 %458  ;;  %v4520_v54 = vsel %vm5210_vm1, %v3135_v5, %v4479_v45  ;;  %vm5211_vm2 = vmmov %vm5210_vm1  ;;  %v4530_v60 = vsel %vm5213_vm9, %v5212_v28, %v3134_v49  ;;  %v4551_v28 = vand.u32 31, %v4504_v19  ;;  %vm5224_vm9 = vcmp.lt.s32.totalorder %v3845_v52, 64 }
 0x15c   : > { %v4524_v38 = vsel %vm5211_vm2, %v3134_v49, %v3135_v5  ;;  %vm4535_vm12 = vmpackc.low %vm3399_vm7, %vm1461_vm0  ;;  %v2743_v26 = vpack.c.bf16 %v1754_v31, %v4520_v54  ;;  %v2665_v5 = vpack.c.bf16 %v1752_v39, %v4530_v60  ;;  %v3138_v10 = vpop.permute.xlu0 %3137  ;;  %v4547_v49 = vand.u32 31, %v387_v44 }
 0x15d   : > { %v2746_v34 = vpack.c.bf16 %v1753_v3, %v4524_v38  ;;  %v3140_v57 = vunpack.i.h.bf16 %v3138_v10  ;;  %v3139_v9 = vunpack.i.l.bf16 %v3138_v10  ;;  %vm481_vm0 = vcmp.ge.s32.totalorder %v4482_v36, 576  ;;  %vm4587_vm1 = vmpackc.low %vm3399_vm7, %vm490_vm5 }
 0x15e   : > { %2667 = vmatprep.subr.msk.bf16.mxu0 %vm4499_vm4, %v2665_v5  ;;  %2745 = vmatprep.subr.msk.bf16.mxu1 %vm4510_vm11, %v2743_v26  ;;  %vm492_vm15 = vcmp.ge.s32.totalorder %v4547_v49, 18  ;;  %vm4572_vm3 = vmand %vm481_vm0, %vm489_vm10  ;;  %v5220_v44 = vunpack.i.l.bf16 %v3949_v43  ;;  %vm491_vm2 = vcmp.ge.s32.totalorder %v4551_v28, 18  ;;  %v5254_v36 = vunpack.i.l.bf16 %v4292_v4 }
 0x15f   : > { %v540_v0 = vpop.permute.xlu1 %539  ;;  %2670 = vmatpush1.bf16.msk.msra.mxu0 %vm4535_vm12, %v2668_v56  ;;  %2748 = vmatpush1.bf16.msk.msra.mxu1 %vm2747_vm14, %v2746_v34  ;;  %v473_v34 = vsel %vm5218_vm13, %v3140_v57, %v459_v15  ;;  %vm5219_vm4 = vmmov %vm5218_vm13  ;;  %v5258_v4 = vmov 0.0|0.0  }
 0x160   : > { %v3143_v27 = vpop.permute.xlu0 %3142  ;;  %v474_v39 = vsel %vm5219_vm4, %v3139_v9, %v3140_v57  ;;  %vm5221_vm11 = vmmov %vm5219_vm4  ;;  %vm5228_vm4 = vcmask 785408  }
 0x161   : > { %v3145_v10 = vunpack.i.h.bf16 %v3143_v27  ;;  %v3144_v26 = vunpack.i.l.bf16 %v3143_v27  ;;  %v475_v3 = vsel %vm5221_vm11, %v5220_v44, %v3139_v9  ;;  %vm5225_vm12 = vmmov %vm5224_vm9  ;;  %v5235_v44 = vunpack.i.l.bf16 %v4014_v37 }
 0x162   : > { %2068 = vmatmul.mubr.f32.vlgmr.msra.gmra.mrb[0].mxu0 %v4565_v63  ;;  %2139 = vmatmul.mubr.f32.vlgmr.msra.gmra.mrb[0].mxu1 %v4565_v63  ;;  %vm5227_vm14 = vmmov %vm5224_vm9  ;;  %v5241_v37 = vunpack.i.h.bf16 %v3888_v13 }
 0x163   : > { %v597_v31 = vpop.permute.xlu1 %596  ;;  %v554_v43 = vsel %vm5224_vm9, %v3145_v10, %v540_v0  ;;  %v555_v9 = vsel %vm5225_vm12, %v3144_v26, %v3145_v10  ;;  %v556_v15 = vsel %vm5227_vm14, %v5226_v12, %v3144_v26  ;;  %vm2828_vm13 = vmpackc.low %vm3399_vm7, %vm492_vm15  ;;  %2470 = vmatprep.mubr.msk.f32.mxu1 %vm5228_vm4, %v3813_v46  ;;  %vm622_vm12 = vcmp.lt.s32.totalorder %v4547_v49, 14 }
 0x164   : > { %vm5229_vm11 = vmmov %vm5228_vm4  ;;  %v2749_v1 = vpack.c.bf16 %v556_v15, %v475_v3  ;;  %v2827_v0 = vpack.c.bf16 %v554_v43, %v473_v34  ;;  %v2830_v5 = vpack.c.bf16 %v555_v9, %v474_v39  ;;  %v3148_v56 = vpop.permute.xlu0 %3147  ;;  %vm619_vm4 = vcmp.lt.s32.totalorder %v4515_v16, 14 }
 0x165   : > { %2469 = vmatprep.mubr.msk.f32.mxu0 %vm5229_vm11, %v3813_v46  ;;  %vm2753_vm9 = vmpackc.low %vm481_vm0, %vm4572_vm3  ;;  %v3150_v50 = vunpack.i.h.bf16 %v3148_v56  ;;  %v3149_v57 = vunpack.i.l.bf16 %v3148_v56  ;;  %vm5230_vm11 = vcmp.lt.s32.totalorder %v3845_v52, 46  ;;  %vm5231_vm3 = vcmp.lt.s32.totalorder %v3845_v52, 18 }
 0x166   : > { %vm2831_vm14 = vmpackc.low %vm3399_vm7, %vm491_vm2  ;;  %2751 = vmatprep.subr.msk.bf16.mxu0 %vm4587_vm1, %v2749_v1  ;;  %2829 = vmatprep.subr.msk.bf16.mxu1 %vm2828_vm13, %v2827_v0  ;;  %vm621_vm1 = vcmp.lt.s32.totalorder %v4551_v28, 14 }
 0x167   : > { %v676_v27 = vpop.permute.xlu1 %675  ;;  %v611_v46 = vsel %vm5230_vm11, %v3150_v50, %v597_v31  ;;  %2754 = vmatpush1.bf16.msk.msra.mxu0 %vm2753_vm9, %v3995_v14  ;;  %vm2834_vm6 = vmpackc.low %vm492_vm15, %vm622_vm12  ;;  %2832 = vmatpush1.bf16.msk.msra.mxu1 %vm2831_vm14, %v2830_v5  ;;  %v3173_v5 = vld [vmem:[%s3638_s18 + $0x38] sm:$0xff] }
 0x168   : > { %v680_v10 = vsel %vm5231_vm3, %v676_v27, %v3863_v58  ;;  %v3153_v59 = vpop.permute.xlu0 %3152  ;;  %vm4636_vm13 = vmand %vm481_vm0, %vm619_vm4 }
 0x169   : > { %v2833_v26 = vpack.c.bf16 %v680_v10, %v611_v46  ;;  %v3155_v34 = vunpack.i.h.bf16 %v3153_v59  ;;  %v3154_v39 = vunpack.i.l.bf16 %v3153_v59  ;;  %vm5234_vm15 = vmmov %vm5230_vm11 }
 0x16a   : > { %v612_v14 = vsel %vm5234_vm15, %v3149_v57, %v3150_v50  ;;  %vm5236_vm9 = vmmov %vm5230_vm11 }
 0x16b   : > { %v613_v3 = vsel %vm5236_vm9, %v5235_v44, %v3149_v57  ;;  %v743_v31 = vpop.permute.xlu1 %742  ;;  %2835 = vmatprep.subr.msk.bf16.mxu1 %vm2834_vm6, %v2833_v26  ;;  %vm4650_vm14 = vmpackc.low %vm490_vm5, %vm620_vm8  ;;  %vm5243_vm6 = vcmp.lt.s32.totalorder %v3845_v52, 110  ;;  %v5250_v26 = vunpack.i.h.bf16 %v3927_v35 }
 0x16c   : > { %vm5239_vm0 = vmmov %vm5231_vm3  ;;  %v752_v12 = vsel %vm5243_vm6, %v743_v31, %v3903_v22  ;;  %v3158_v13 = vpop.permute.xlu0 %3157 }
 0x16d   : > { %v681_v8 = vsel %vm5239_vm0, %v3155_v34, %v676_v27  ;;  %vm5240_vm11 = vmmov %vm5239_vm0  ;;  %v2839_v56 = vpack.c.bf16 %v752_v12, %v3173_v5  ;;  %v3160_v22 = vunpack.i.h.bf16 %v3158_v13  ;;  %v3159_v50 = vunpack.i.l.bf16 %v3158_v13 }
 0x16e   : > { %v682_v43 = vsel %vm5240_vm11, %v3154_v39, %v3155_v34  ;;  %vm5242_vm3 = vmmov %vm5239_vm0  ;;  %v2836_v0 = vpack.c.bf16 %v681_v8, %v612_v14  ;;  %v3175_v14 = vld [vmem:[%s3638_s18 + $0x28] sm:$0xff]  ;;  %vm5257_vm0 = vcmp.lt.s32.totalorder %v3845_v52, 70  ;;  %vm953_vm11 = vcmp.ge.s32.totalorder %v4547_v49, 12 }
 0x16f   : > { %v683_v9 = vsel %vm5242_vm3, %v5241_v37, %v3154_v39  ;;  %vm2837_vm5 = vmpackc.low %vm491_vm2, %vm621_vm1  ;;  %v2755_v15 = vpack.c.bf16 %v682_v43, %v613_v3  ;;  %v3174_v39 = vld [vmem:[%s3638_s18 + $0x30] sm:$0xff]  ;;  %v3176_v3 = vld [vmem:[%s3638_s18 + $0x20] sm:$0xff]  ;;  %v5256_v43 = vunpack.i.h.bf16 %v4249_v6  ;;  %vm952_vm3 = vcmp.ge.s32.totalorder %v4551_v28, 12  ;;  %s378_s18 = scalar_lea.vmem [#allocation11], %s3634_s26 }
 0x170   : > { %v2758_v1 = vpack.c.bf16 %v683_v9, %v4054_v55  ;;  %vm2759_vm15 = vmpackc.low %vm489_vm10, %vm4636_vm13  ;;  %v4682_v55 = vpop.permute.xlu1 %1392  ;;  %2838 = vmatpush1.bf16.msk.msra.mxu1 %vm2837_vm5, %v2836_v0  ;;  %v4713_v35 = vpop.permute.xlu0 %1311  ;;  %vm950_vm5 = vcmp.ge.s32.totalorder %v4515_v16, 12  ;;  %v5261_v5 = vunpack.i.h.bf16 %v4342_v20  ;;  %v5263_v13 = vmov 0.0   ;;  %v3180_v34 = vld [vmem:[%s3646_s29 + $0x28] sm:$0xff] }
 0x171   : > { %vm4678_vm2 = vmpackc.low %vm622_vm12, %vm3399_vm7  ;;  %2757 = vmatprep.subr.msk.bf16.mxu0 %vm4650_vm14, %v2755_v15  ;;  %v4730_v37 = vsel %vm5257_vm0, %v4713_v35, %v5256_v43  ;;  %vm1055_vm0 = vcmp.lt.s32.totalorder %v4515_v16, 20  ;;  %v5288_v43 = vld [vmem:[#allocation22_spill] sm:$0xff] }
 0x172   : > { %vm4689_vm10 = vmpackc.low %vm620_vm8, %vm3399_vm7  ;;  %2760 = vmatpush1.bf16.msk.msra.mxu0 %vm2759_vm15, %v2758_v1  ;;  %2841 = vmatprep.subr.msk.bf16.mxu1 %vm4678_vm2, %v2839_v56  ;;  %v5259_v1 = vunpack.i.h.bf16 %v4373_v29  ;;  %vm5260_vm15 = vcmp.lt.s32.totalorder %v3845_v52, 6  ;;  %vm5262_vm2 = vcmp.lt.s32.totalorder %v3845_v52, 58 }
 0x173   : > { %vm5248_vm13 = vmmov %vm5243_vm6 }
 0x174   : > { %v745_v46 = vsel %vm5248_vm13, %v3160_v22, %v743_v31  ;;  %vm5249_vm12 = vmmov %vm5243_vm6  ;;  %v4735_v12 = vpop.permute.xlu1 %3162  ;;  %v1449_v15 = vpop.permute.xlu0 %1448  ;;  %vm1058_vm13 = vcmp.lt.s32.totalorder %v4547_v49, 20 }
 0x175   : > { %v746_v10 = vsel %vm5249_vm12, %v3159_v50, %v3160_v22  ;;  %vm5251_vm9 = vmmov %vm5243_vm6  ;;  %v2842_v58 = vpack.c.bf16 %v745_v46, %v3174_v39  ;;  %v3164_v6 = vunpack.i.l.bf16 %v4735_v12  ;;  %v4762_v56 = vsel %vm5262_vm2, %v1449_v15, %v5261_v5 }
 0x176   : > { %v747_v59 = vsel %vm5251_vm9, %v5250_v26, %v3159_v50  ;;  %vm4704_vm14 = vmpackc.low %vm621_vm1, %vm3399_vm7  ;;  %v2761_v44 = vpack.c.bf16 %v746_v10, %v3175_v14  ;;  %vm5255_vm1 = vcmp.lt.s32.totalorder %v3845_v52, 64  ;;  %v2847_v22 = vpack.c.bf16 %v4182_v42, %v5263_v13 }
 0x177   : > { %v2764_v31 = vpack.c.bf16 %v747_v59, %v3176_v3  ;;  %vm2765_vm8 = vmpackc.low %vm619_vm4, %vm3399_vm7  ;;  %v4723_v8 = vsel %vm5255_vm1, %v4682_v55, %v5254_v36  ;;  %2844 = vmatpush1.bf16.msk.msra.mxu1 %vm4704_vm14, %v2842_v58  ;;  %vm951_vm4 = vcmp.ge.s32.totalorder %v4539_v53, 12  ;;  %v4756_v0 = vsel %vm5260_vm15, %v5259_v1, %v3164_v6  ;;  %v5285_v3 = vld [vmem:[#allocation24_spill] sm:$0xff]  ;;  %v5294_v1 = vld [vmem:[#allocation23_spill] sm:$0xff] }
 0x178   : > { %v2815_v9 = vpack.c.bf16 %v4723_v8, %v4730_v37  ;;  %2763 = vmatprep.subr.msk.bf16.mxu0 %vm4689_vm10, %v2761_v44  ;;  %2845 = vmatprep.subr.bf16.mxu1 %v5258_v4  ;;  %vm2848_vm6 = vmpackc.low %vm953_vm11, %vm3399_vm7  ;;  %v4770_v29 = vpop.permute.xlu1 %3167  ;;  %vm1056_vm9 = vcmp.lt.s32.totalorder %v4539_v53, 20  ;;  %v4791_v27 = vpop.permute.xlu0 %1521  ;;  %v5269_v10 = vunpack.i.h.bf16 %v4391_v2  ;;  %vm5270_vm15 = vcmp.lt.s32.totalorder %v3845_v52, 122 }
 0x179   : > { %2766 = vmatpush1.bf16.msk.msra.mxu0 %vm2765_vm8, %v2764_v31  ;;  %vm2770_vm10 = vmpackc.low %vm951_vm4, %vm3399_vm7  ;;  %v3169_v50 = vunpack.i.l.bf16 %v4770_v29  ;;  %vm1057_vm8 = vcmp.lt.s32.totalorder %v4551_v28, 20  ;;  %v2781_v39 = vpack.c.bf16 %v3180_v34, %v4178_v40  ;;  %v3182_v40 = vld [vmem:[%s3646_s29 + $0x20] sm:$0xff]  ;;  %v2806_v20 = vpack.c.bf16 %v4756_v0, %v4530_v60  ;;  %v1758_v60 = vld [vmem:[%s3657_s19 + $0x38] sm:$0xff] }
 0x17a   : > { %2767 = vmatprep.subr.bf16.mxu0 %v5258_v4  ;;  %vm4776_vm12 = vmpackc.low %vm952_vm3, %vm3399_vm7 }
 0x17b   : > { %2846 = vmatpush1.bf16.msra.mxu1 %v5258_v4  ;;  %vm4786_vm14 = vmpackc.low %vm950_vm5, %vm3399_vm7 }
 0x17c   : > { %2849 = vmatprep.subr.msk.bf16.mxu1 %vm2848_vm6, %v2847_v22  ;;  %vm2854_vm1 = vmpackc.low %vm1058_vm13, %vm3399_vm7  ;;  %v1589_v14 = vpop.permute.xlu0 %1588  ;;  %v3183_v22 = vld [vmem:[%s3653_s15 + $0x28] sm:$0xff] }
 0x17d   : > { %2768 = vmatpush1.bf16.msra.mxu0 %v5258_v4  ;;  %vm5268_vm6 = vmmov %vm5262_vm2  ;;  %vm5271_vm2 = vcmp.lt.s32.totalorder %v3845_v52, 6 }
 0x17e   : > { %2771 = vmatprep.subr.msk.bf16.mxu0 %vm2770_vm10, %v4091_v32  ;;  %v4801_v46 = vsel %vm5268_vm6, %v4479_v45, %v1449_v15  ;;  %v4809_v32 = vsel %vm5270_vm15, %v5269_v10, %v3169_v50  ;;  %v4815_v26 = vsel %vm5271_vm2, %v4791_v27, %v4356_v7  ;;  %vm2776_vm10 = vmpackc.low %vm1056_vm9, %vm3399_vm7  ;;  %v3177_v45 = vld [vmem:[%s3646_s29 + $0x10] sm:$0xff]  ;;  %v1756_v10 = vld [vmem:[%s3657_s19 + $0x28] sm:$0xff] }
 0x17f   : > { %v2775_v59 = vpack.c.bf16 %v4166_v25, %v3177_v45  ;;  %v2879_v2 = vpack.c.bf16 %v4815_v26, %v4801_v46  ;;  %2852 = vmatpush1.bf16.msk.msra.mxu1 %vm4776_vm12, %v4133_v61  ;;  %vm2857_vm6 = vmpackc.low %vm1057_vm8, %vm3399_vm7  ;;  %v3178_v61 = vld [vmem:[%s3646_s29 + $0x38] sm:$0xff]  ;;  %v2895_v26 = vpack.c.bf16 %v1758_v60, %v5263_v13  ;;  %v2821_v45 = vpack.c.bf16 %v1756_v10, %v4762_v56  ;;  %v5297_v13 = vld [vmem:[#allocation20_spill] sm:$0xff] }
 0x180   : > { %2855 = vmatprep.subr.msk.bf16.mxu1 %vm2854_vm1, %v4197_v17  ;;  %vm4837_vm15 = vmpackc.low %vm1055_vm0, %vm3399_vm7  ;;  %v2859_v7 = vpack.c.bf16 %v3178_v61, %v4122_v47 }
 0x181   : > { %2774 = vmatpush1.bf16.msk.msra.mxu0 %vm4786_vm14, %v4094_v33  ;;  %vm2860_vm12 = vmpackc.low %vm3399_vm7, %vm953_vm11  ;;  %v3179_v33 = vld [vmem:[%s3646_s29 + $0x8] sm:$0xff] }
 0x182   : > { %2777 = vmatprep.subr.msk.bf16.mxu0 %vm2776_vm10, %v2775_v59  ;;  %v2778_v17 = vpack.c.bf16 %v4187_v48, %v3179_v33  ;;  %vm2782_vm14 = vmpackc.low %vm3399_vm7, %vm951_vm4  ;;  %v3181_v48 = vld [vmem:[%s3646_s29 + $0x30] sm:$0xff]  ;;  %vm1339_vm10 = vcmp.ge.s32.totalorder %v4547_v49, 6  ;;  %s2480_s29 = sshll.u32 %s3459_s25, 10  ;;  %s2296_s25 = scalar_lea.sflag [#allocation5], %s3631_s28 }
 0x183   : > { %2858 = vmatpush1.bf16.msk.msra.mxu1 %vm2857_vm6, %v4264_v18  ;;  %vm2863_vm11 = vmpackc.low %vm3399_vm7, %vm952_vm3  ;;  %v2862_v58 = vpack.c.bf16 %v3181_v48, %v4158_v30  ;;  %v2784_v18 = vpack.c.bf16 %v3182_v40, %v4182_v42  ;;  %vm1337_vm6 = vcmp.ge.s32.totalorder %v4539_v53, 6  ;;  %v3165_v42 = vunpack.i.h.bf16 %v4735_v12  ;;  %s5053_s26 = scalar_lea.hbm %s5103_s6, %s2480_s29 }
 0x184   : > { %2861 = vmatprep.subr.msk.bf16.mxu1 %vm2860_vm12, %v2859_v7  ;;  %vm2785_vm1 = vmpackc.low %vm3399_vm7, %vm950_vm5  ;;  %vm1336_vm12 = vcmp.ge.s32.totalorder %v4515_v16, 6 }
 0x185   : > { %2780 = vmatpush1.bf16.msk.msra.mxu0 %vm4837_vm15, %v2778_v17  ;;  %vm2866_vm4 = vmpackc.low %vm3399_vm7, %vm1058_vm13 }
 0x186   : > { %2783 = vmatprep.subr.msk.bf16.mxu0 %vm2782_vm14, %v2781_v39  ;;  %vm2788_vm3 = vmpackc.low %vm3399_vm7, %vm1056_vm9  ;;  %vm5274_vm9 = vcmp.lt.s32.totalorder %v3845_v52, 70 }
 0x187   : > { %2864 = vmatpush1.bf16.msk.msra.mxu1 %vm2863_vm11, %v2862_v58  ;;  %vm2869_vm2 = vmpackc.low %vm3399_vm7, %vm1057_vm8  ;;  %v1317_v30 = vsel %vm5274_vm9, %v4460_v41, %v4713_v35  ;;  %vm5277_vm8 = vcmp.lt.s32.totalorder %v3845_v52, 64  ;;  %vm1468_vm11 = vcmp.lt.s32.totalorder %v4547_v49, 26  ;;  %vm1465_vm9 = vcmp.lt.s32.totalorder %v4515_v16, 26  ;;  %v3186_v49 = vld [vmem:[%s3653_s15 + $0x20] sm:$0xff] }
 0x188   : > { %2867 = vmatprep.subr.msk.bf16.mxu1 %vm2866_vm4, %v4270_v24  ;;  %vm2791_vm13 = vmpackc.low %vm950_vm5, %vm1055_vm0  ;;  %vm1338_vm5 = vcmp.ge.s32.totalorder %v4551_v28, 6  ;;  %v5276_v24 = vunpack.i.h.bf16 %v4451_v11  ;;  %vm1466_vm4 = vcmp.lt.s32.totalorder %v4539_v53, 26  ;;  %v2812_v0 = vpack.c.bf16 %v4809_v32, %v3186_v49  ;;  %v1757_v32 = vld [vmem:[%s3657_s19 + $0x30] sm:$0xff] }
 0x189   : > { %2786 = vmatpush1.bf16.msk.msra.mxu0 %vm2785_vm1, %v2784_v18  ;;  %vm2874_vm0 = vmpackc.low %vm3399_vm7, %vm1339_vm10 }
 0x18a   : > { %2789 = vmatprep.subr.msk.bf16.mxu0 %vm2788_vm3, %v4256_v51  ;;  %v5275_v51 = vpack.c.bf16 %v4122_v47, %v4150_v21  ;;  %v1397_v41 = vsel %vm5277_vm8, %v5276_v24, %v4682_v55  ;;  %v2794_v47 = vpack.c.bf16 %v4245_v62, %v3178_v61  ;;  %vm4909_vm14 = vmpackc.low %vm3399_vm7, %vm1337_vm6  ;;  %vm5282_vm3 = vcmp.lt.s32.totalorder %v3845_v52, 6 }
 0x18b   : > { %2870 = vmatpush1.bf16.msk.msra.mxu1 %vm2869_vm2, %v4273_v23  ;;  %v2818_v21 = vpack.c.bf16 %v1397_v41, %v1317_v30  ;;  %v3170_v23 = vunpack.i.h.bf16 %v4770_v29  ;;  %vm4918_vm1 = vmpackc.low %vm3399_vm7, %vm1338_vm5  ;;  %v1528_v62 = vsel %vm5282_vm3, %v3164_v6, %v3165_v42  ;;  %vm5286_vm8 = vcmp.lt.s32.totalorder %v3845_v52, 122  ;;  %v5290_v6 = vld [vmem:[#allocation25_spill] sm:$0xff] }
 0x18c   : > { %2871 = vmatprep.subr.bf16.mxu1 %v5258_v4  ;;  %vm4932_vm2 = vmpackc.low %vm3399_vm7, %vm1336_vm12  ;;  %v2803_v36 = vpack.c.bf16 %v1528_v62, %v4524_v38 }
 0x18d   : > { %2792 = vmatpush1.bf16.msk.msra.mxu0 %vm2791_vm13, %v5275_v51  ;;  %vm1467_vm13 = vcmp.lt.s32.totalorder %v4551_v28, 26  ;;  %v1592_v31 = vsel %vm5286_vm8, %v3169_v50, %v3170_v23  ;;  %v3184_v50 = vld [vmem:[%s3653_s15 + $0x38] sm:$0xff]  ;;  %v5298_v28 = vld [vmem:[#allocation21_spill] sm:$0xff] }
 0x18e   : > { %2793 = vmatprep.subr.bf16.mxu0 %v5258_v4  ;;  %v2809_v29 = vpack.c.bf16 %v1592_v31, %v3183_v22  ;;  %v2897_v8 = vpack.c.bf16 %v1757_v32, %v5298_v28 }
 0x18f   : > { %2872 = vmatpush1.bf16.msra.mxu1 %v5258_v4 }
 0x190   : > { %2875 = vmatprep.subr.msk.bf16.mxu1 %vm2874_vm0, %v2818_v21  ;;  %vm5287_vm0 = vmmov %vm5282_vm3 }
 0x191   : > { %2796 = vmatpush1.bf16.msk.msra.mxu0 %vm4837_vm15, %v2794_v47  ;;  %vm2880_vm15 = vmpackc.low %vm1339_vm10, %vm1468_vm11  ;;  %v1527_v35 = vsel %vm5287_vm0, %v3165_v42, %v4791_v27 }
 0x192   : > { %2799 = vmatprep.subr.msk.bf16.mxu0 %vm4909_vm14, %v5285_v3  ;;  %vm2804_vm3 = vmpackc.low %vm1337_vm6, %vm1466_vm4  ;;  %v2882_v52 = vpack.c.bf16 %v1527_v35, %v4520_v54  ;;  %v3185_v54 = vld [vmem:[%s3653_s15 + $0x30] sm:$0xff]  ;;  %s2310_s15 = sshll.u32 %s378_s18, 4  ;;  %s5055_s15 = int_to_ptr.vmem [resolvable:$true] %s2310_s15 }
 0x193   : > { %vm5289_vm10 = vmmov %vm5286_vm8  ;;  %2878 = vmatpush1.bf16.msk.msra.mxu1 %vm4918_vm1, %v5290_v6  ;;  %s3307_s27 = scalar_lea.vmem %s5055_s15, 1024  ;;  %p3314_p8 = scmp.lt.s32.totalorder %s5055_s15, %s3312_s10 }
 0x194   : > { %v1598_v12 = vsel %vm5289_vm10, %v1589_v14, %v5288_v43  ;;  %vm4967_vm8 = vmpackc.low %vm1338_vm5, %vm1467_vm13  ;;  %2881 = vmatprep.subr.msk.bf16.mxu1 %vm2880_vm15, %v2879_v2  ;;  %vm1637_vm15 = vcmp.lt.s32.totalorder %v4504_v19, 832  ;;  %p3308_p3 = scmp.ne.s32.totalorder %s5055_s15, %s3307_s27  ;;  %p3315_p13 = scmp.lt.s32.totalorder %s3313_s12, %s3307_s27 }
 0x195   : > { %vm5293_vm6 = vmmov %vm5289_vm10  ;;  %2802 = vmatpush1.bf16.msk.msra.mxu0 %vm4932_vm2, %v5294_v1  ;;  %v2885_v57 = vpack.c.bf16 %v1598_v12, %v3184_v50 }
 0x196   : > { %v1591_v38 = vsel %vm5293_vm6, %v3170_v23, %v1589_v14  ;;  %vm4983_vm1 = vmpackc.low %vm1336_vm12, %vm1465_vm9  ;;  %2805 = vmatprep.subr.msk.bf16.mxu0 %vm2804_vm3, %v2803_v36  ;;  %p3309_p12 = pnand %p3308_p3, %p5299_p6  ;;  %p3316_p11 = por %p3315_p13, %p3314_p8 }
 0x197   : > { %vm2886_vm0 = vmpackc.low %vm1468_vm11, %vm3399_vm7  ;;  %v2888_v27 = vpack.c.bf16 %v1591_v38, %v3185_v54  ;;  %2884 = vmatpush1.bf16.msk.msra.mxu1 %vm4967_vm8, %v2882_v52 }
 0x198   : > { %vm2810_vm12 = vmpackc.low %vm1466_vm4, %vm3399_vm7  ;;  %2887 = vmatprep.subr.msk.bf16.mxu1 %vm2886_vm0, %v2885_v57  ;;  %p3310_p0 = pneg %p3309_p12 }
 0x199   : > { %vm2889_vm11 = vmpackc.low %vm1467_vm13, %vm3399_vm7  ;;  %2808 = vmatpush1.bf16.msk.msra.mxu0 %vm4983_vm1, %v2806_v20 }
 0x19a   : > { %vm2813_vm3 = vmpackc.low %vm1465_vm9, %vm3399_vm7  ;;  %2811 = vmatprep.subr.msk.bf16.mxu0 %vm2810_vm12, %v2809_v29  ;;  %v1997_v19 = vpop.permute.xlu1 %1996  ;;  %p3317_p1 = pnand %p3316_p11, %p3310_p0 }
 0x19b   : > { %vm1645_vm10 = vmand %vm1637_vm15, %vm1338_vm5  ;;  %2890 = vmatpush1.bf16.msk.msra.mxu1 %vm2889_vm11, %v2888_v27 }
 0x19c   : > { %2891 = vmatprep.subr.bf16.mxu1 %v5258_v4  ;;  %vm2893_vm8 = vmpackc.low %vm1637_vm15, %vm1645_vm10  ;;  %v1755_v4 = vld [vmem:[%s3657_s19 + $0x20] sm:$0xff] }
 0x19d   : > { %2814 = vmatpush1.bf16.msk.msra.mxu0 %vm2813_vm3, %v2812_v0  ;;  %vm1717_vm5 = vmand %vm1637_vm15, %vm1467_vm13  ;;  %v2824_v53 = vpack.c.bf16 %v1755_v4, %v4801_v46 }
 0x19e   : > { %2817 = vmatprep.subr.msk.bf16.mxu0 %vm4909_vm14, %v2815_v9  ;;  %vm2822_vm6 = vmpackc.low %vm3399_vm7, %vm1466_vm4 }
 0x19f   : > { %2894 = vmatpush1.bf16.msk.msra.mxu1 %vm2893_vm8, %v5297_v13  ;;  %vm2898_vm14 = vmpackc.low %vm3399_vm7, %vm1717_vm5 }
 0x1a0   : > { %2896 = vmatprep.subr.bf16.mxu1 %v2895_v26  ;;  %vm2825_vm13 = vmpackc.low %vm3399_vm7, %vm1465_vm9 }
 0x1a1   : > { %2820 = vmatpush1.bf16.msk.msra.mxu0 %vm4932_vm2, %v2818_v21 }
 0x1a2   : > { %2823 = vmatprep.subr.msk.bf16.mxu0 %vm2822_vm6, %v2821_v45 }
 0x1a3   : > { %2899 = vmatpush1.bf16.msk.msra.mxu1 %vm2898_vm14, %v2897_v8 }
 0x1a5   : > { %2826 = vmatpush1.bf16.msk.msra.mxu0 %vm2825_vm13, %v2824_v53 }
 0x1a6   : > { %2281 = vmatmul.mubr.f32.vlgmr.msra.gmra.mrb[2].mxu1 %v4565_v63 }
 0x1a8   : > { %2210 = vmatmul.mubr.f32.vlgmr.msra.gmra.mrb[2].mxu0 %v4565_v63 }
 0x235   : > { %v2069_v37 = vpop.f32.mrb[0].mxu0  ;;  %v2140_v9 = vpop.f32.mrb[0].mxu1 }
 0x236   : > { %v2070_v56 = vadd.f32 %v2069_v37, %v1997_v19  ;;  %v2141_v59 = vadd.f32 %v2140_v9, %v1997_v19  ;;  %v2071_v2 = vpop.f32.mrb[1].mxu0  ;;  %v2142_v25 = vpop.f32.mrb[1].mxu1 }
 0x237   : > { %v2072_v16 = vadd.f32 %v2071_v2, %v1997_v19  ;;  %v2143_v61 = vadd.f32 %v2142_v25, %v1997_v19 }
 0x238   : > { %2287 = vst [vmem:[%s378_s18] sm:$0xff] %v2070_v56  ;;  %2289 = vst [vmem:[%s378_s18 + $0x10] sm:$0xff] %v2141_v59 }
 0x239   : > { %2288 = vst [vmem:[%s378_s18 + $0x8] sm:$0xff] %v2072_v16  ;;  %2290 = vst [vmem:[%s378_s18 + $0x18] sm:$0xff] %v2143_v61 }
 0x279   : > { %v2282_v46 = vpop.f32.mrb[2].mxu1 }
 0x27a   : > { %v2283_v63 = vadd.f32 %v2282_v46, %v1997_v19  ;;  %v2284_v33 = vpop.f32.mrb[3].mxu1 }
 0x27b   : > { %v2211_v7 = vpop.f32.mrb[2].mxu0  ;;  %v2285_v34 = vadd.f32 %v2284_v33, %v1997_v19 }
 0x27c   : > { %v2212_v17 = vadd.f32 %v2211_v7, %v1997_v19  ;;  %v2213_v39 = vpop.f32.mrb[3].mxu0  ;;  %2293 = vst [vmem:[%s378_s18 + $0x30] sm:$0xff] %v2283_v63 }
 0x27d   : > { %v2214_v48 = vadd.f32 %v2213_v39, %v1997_v19  ;;  %2294 = vst [vmem:[%s378_s18 + $0x38] sm:$0xff] %v2285_v34 }
 0x27e   : > { %2291 = vst [vmem:[%s378_s18 + $0x20] sm:$0xff] %v2212_v17 }
 0x27f   : > { %2292 = vst [vmem:[%s378_s18 + $0x28] sm:$0xff] %v2214_v48 }
 0x280   : > { %3320 = shalt.err (!%p3317_p1)
}
 0x281   : > { %s3321_s28 = scalar_lea.hbm %s5053_s26, 1024  ;;  %s3325_s16 = scalar_lea.hbm %s5103_s6, 2048 }
 0x282   : > { %p3322_p10 = scmp.ne.s32.totalorder %s5053_s26, %s3321_s28  ;;  %p3326_p9 = scmp.lt.u32.totalorder %s5053_s26, %s5103_s6 }
 0x283   : > { %p3327_p5 = scmp.lt.u32.totalorder %s3325_s16, %s3321_s28  ;;  %p3329_p3 = scmp.lt.u32.totalorder %s3321_s28, %s5053_s26 }
 0x284   : > { %p3323_p4 = pnand %p3322_p10, %p5299_p6 }
 0x285   : > { %p3328_p2 = por %p3327_p5, %p3326_p9 }
 0x286   : > { %p3324_p7 = pneg %p3323_p4 }
 0x287   : > { %p3330_p12 = por %p3329_p3, %p3328_p2 }
 0x289   : > { %p3331_p0 = pnand %p3330_p12, %p3324_p7 }
 0x28b   : > { %3334 = shalt.err (!%p3331_p0)
}
 0x28c   : > { %2908 = dma.vmem_to_hbm [thread:$0]  (%p5299_p6), %s5055_s15, 1024, %s5053_s26, %s2296_s25  }
 0x28d PF: > { %s5300_s30 = sld [smem:[#allocation17_spill]]  ;;  %s2322_s7 = sand.u32 1, %s3369_s21  }
 0x28e   : > { %p5301_p8 = scmp.ne.s32.totalorder %s5151_s9, 0  ;;  %s2323_s1 = scalar_lea.sflag [#allocation5], %s2322_s7 }
 0x293   : > { %p5302_p13 = scmp.ge.s32.totalorder %s5300_s30, 2 }
 0x295   : > { %p2924_p11 = pnand %p5302_p13, %p5301_p8 }
 0x297   : > { %3364 = dma.done.wait (!%p2924_p11), %s2323_s1, 1024  }
 0x298   : > { %3366 = vsyncadd (!%p2924_p11), %s2323_s1, 4294966272  ;;  %s5303_s24 = sld [smem:[#allocation18_spill]]  ;;  %s5304_s20 = sld [smem:[#allocation16_spill]] }
 0x299   : > { %s5305_s23 = sld [smem:[#allocation19_spill]]  ;;  %s5306_s21 = smov %s3373_s22 }
 0x29e   : > { %p25_p1 = scmp.ge.s32.totalorder %s5303_s24, 4   ;;  %s5307_s22 = smov %s5304_s20 }
 0x2a0   :  { %27 = sbr.rel (!%p25_p1) target bundleno = 11 (0xb), region = 126 }
 0x2a7   :  { %2328 = vsyncpa [#allocation4], 1 }
 0x2a8   :  { %2330 = vsyncpa [#allocation4 + $0x1], 1 }
 0x2a9   :  { %2331 = vsyncpa [#allocation7], 1 }
 0x2aa   :  { %2333 = vsyncpa [#allocation7 + $0x1], 1 }
 0x2ab   :  { %2334 = vsyncpa [#allocation10], 1 }
 0x2ac   :  { %2336 = vsyncpa [#allocation10 + $0x1], 1 }
 0x2ad   :  { %2337 = vsyncpa [#allocation5], 1 }
 0x2ae   :  { %2339 = vsyncpa [#allocation5 + $0x1], 1 }

</bundles_post_ra>
